<compile_context>
chip_gen: v7x
topology: tpu7x:2x2x1
jax: 0.10.0
libtpu: 0.0.40
codegen_flags: <defaults>
</compile_context>

<pallas_src>
import functools
import math

import jax
import jax.numpy as jnp
from jax import lax
from jax.experimental import pallas as pl
from jax.experimental.pallas import tpu as pltpu


# -----------------------------------------------------------------------------
# Fused kernel: whole encoder stack in one invocation, weights resident in VMEM
# -----------------------------------------------------------------------------
def fused_encoder_kernel(
    x_ref,      # (N, E)        input activation
    wqkv_ref,   # (L, E, 3E)    fused QKV weights (pre-transposed, q pre-scaled) bf16
    bqkv_ref,   # (L, 1, 3E)    fused QKV bias (q pre-scaled) f32
    wo_ref,     # (L, E, E)     out-proj weight (pre-transposed) bf16
    vecs_ref,   # (L, 6, E)     rows: [b_o, g1, beta1, b2, g2, beta2] f32
    w1_ref,     # (L, E, HD)    feed_forward[0].weight.T bf16
    b1_ref,     # (L, 1, HD)    f32
    w2_ref,     # (L, HD, E)    feed_forward[2].weight.T bf16
    o_ref,      # (N, E)        output
    *,
    num_layers: int,
    num_heads: int,
    head_dim: int,
    batch: int,
    seq: int,
):
    eps = 1e-5
    H, hd, B, S = num_heads, head_dim, batch, seq
    N = B * S
    E = H * hd

    x = x_ref[...].astype(jnp.float32)                       # (N, E) f32

    for layer in range(num_layers):                          # static unroll (L small)
        wqkv = wqkv_ref[layer]                               # (E, 3E) bf16
        bqkv = bqkv_ref[layer]                               # (1, 3E) f32
        wo = wo_ref[layer]                                   # (E, E)  bf16
        vecs = vecs_ref[layer]                               # (6, E)  f32
        w1 = w1_ref[layer]                                   # (E, HD) bf16
        b1 = b1_ref[layer]                                   # (1, HD) f32
        w2 = w2_ref[layer]                                   # (HD, E) bf16
        b_o, g1, be1 = vecs[0:1, :], vecs[1:2, :], vecs[2:3, :]
        b2, g2, be2 = vecs[3:4, :], vecs[4:5, :], vecs[5:6, :]

        x_bf = x.astype(jnp.bfloat16)

        # ---- fused QKV projection: one lane-dense MXU pass (scale folded into Wq) ----
        qkv = jnp.dot(x_bf, wqkv, preferred_element_type=jnp.float32) + bqkv   # (N, 3E)

        # ---- gather per-head (B,S,hd) tiles; fold heads into one group axis g=(h,b) ----
        def split_heads(base):
            return jnp.concatenate(
                [qkv[:, base + h * hd: base + (h + 1) * hd].reshape(B, S, hd)
                 for h in range(H)],
                axis=0)                                      # (H*B, S, hd) f32
        qg = split_heads(0).astype(jnp.bfloat16)
        kg = split_heads(E).astype(jnp.bfloat16)
        vg = split_heads(2 * E).astype(jnp.bfloat16)

        # ---- one batched score matmul + ONE softmax across all heads/batches ----
        s = jnp.einsum('gqd,gkd->gqk', qg, kg,
                       preferred_element_type=jnp.float32)   # (H*B, S, S) f32
        s = s - jnp.max(s, axis=-1, keepdims=True)
        p = jnp.exp(s)
        p = p / jnp.sum(p, axis=-1, keepdims=True)           # exact divide (S=8, ~free)

        ctx = jnp.einsum('gqk,gkd->gqd', p.astype(jnp.bfloat16), vg,
                         preferred_element_type=jnp.float32)  # (H*B, S, hd) f32

        # ---- reassemble heads on the lane axis -> (N, E); single fused out-proj ----
        ctx_full = jnp.concatenate(
            [ctx[h * B:(h + 1) * B].reshape(N, hd) for h in range(H)], axis=-1)
        attn = jnp.dot(ctx_full.astype(jnp.bfloat16), wo,
                       preferred_element_type=jnp.float32) + b_o       # (N, E) f32

        # ---- residual + LayerNorm 1 (f32) ----
        x1 = x + attn
        mu1 = jnp.mean(x1, axis=-1, keepdims=True)
        var1 = jnp.mean((x1 - mu1) ** 2, axis=-1, keepdims=True)
        x1n = (x1 - mu1) * lax.rsqrt(var1 + eps) * g1 + be1

        # ---- feed-forward: Linear -> ReLU -> Linear ----
        h1 = jnp.dot(x1n.astype(jnp.bfloat16), w1,
                     preferred_element_type=jnp.float32) + b1
        h1 = jnp.maximum(h1, 0.0)
        ff = jnp.dot(h1.astype(jnp.bfloat16), w2,
                     preferred_element_type=jnp.float32) + b2

        # ---- residual + LayerNorm 2 (f32) ----
        x2 = x1n + ff
        mu2 = jnp.mean(x2, axis=-1, keepdims=True)
        var2 = jnp.mean((x2 - mu2) ** 2, axis=-1, keepdims=True)
        x = (x2 - mu2) * lax.rsqrt(var2 + eps) * g2 + be2

    o_ref[...] = x.astype(o_ref.dtype)


# -----------------------------------------------------------------------------
# Parameter packing: PyTorch-layout params -> stacked, fused, pre-transposed
# -----------------------------------------------------------------------------
def pack_params(params, num_heads):
    E = params[0]["w_o"].shape[0]
    hd = E // num_heads
    HD = params[0]["w1"].shape[0]
    scale = 1.0 / math.sqrt(hd)
    # fold 1/sqrt(head_dim) into the q part of the fused QKV weight & bias
    scale_vec = jnp.concatenate([jnp.full((E,), scale, jnp.float32),
                                 jnp.ones((2 * E,), jnp.float32)])       # (3E,)
    wqkv_l, bqkv_l, wo_l, vecs_l, w1_l, b1_l, w2_l = [], [], [], [], [], [], []
    for p in params:
        w_in = p["in_proj_weight"]                   # (3E, E) rows [Wq; Wk; Wv]
        b_in = p["in_proj_bias"]                     # (3E,)
        wqkv_l.append(w_in.T * scale_vec[None, :])   # (E, 3E) columns [q | k | v]
        bqkv_l.append((b_in * scale_vec).reshape(1, 3 * E))
        wo_l.append(p["w_o"].T)                      # (E, E)
        vecs_l.append(jnp.stack([p["b_o"], p["g1"], p["beta1"],
                                 p["b2"], p["g2"], p["beta2"]]))          # (6, E)
        w1_l.append(p["w1"].T)                       # (E, HD)
        b1_l.append(p["b1"].reshape(1, HD))
        w2_l.append(p["w2"].T)                       # (HD, E)
    return dict(
        wqkv=jnp.stack(wqkv_l).astype(jnp.bfloat16),
        bqkv=jnp.stack(bqkv_l),                      # f32
        wo=jnp.stack(wo_l).astype(jnp.bfloat16),
        vecs=jnp.stack(vecs_l),                      # f32
        w1=jnp.stack(w1_l).astype(jnp.bfloat16),
        b1=jnp.stack(b1_l),                          # f32
        w2=jnp.stack(w2_l).astype(jnp.bfloat16),
    )


# -----------------------------------------------------------------------------
# Wrapper: one fused pallas_call, whole weight stack resident in VMEM
# -----------------------------------------------------------------------------
@functools.partial(jax.jit, static_argnames=("num_heads",))
def transformer_encoder_block(x, packed, *, num_heads):
    """x: (S, B, E) exactly like the PyTorch module; returns (S, B, E)."""
    S, B, E = x.shape
    L = packed["wqkv"].shape[0]
    HD = packed["w1"].shape[2]
    hd = E // num_heads
    N = B * S

    xb = jnp.transpose(x, (1, 0, 2)).reshape(N, E)          # batch-major flatten

    kernel = functools.partial(
        fused_encoder_kernel,
        num_layers=L, num_heads=num_heads, head_dim=hd, batch=B, seq=S,
    )

    # Advisory cost estimate so XLA overlaps the surrounding transposes/reshapes.
    flops = 2 * L * (N * E * 3 * E + 2 * B * num_heads * S * S * hd
                     + N * E * E + 2 * N * E * HD)
    transcendentals = L * (B * num_heads * S * S + 2 * N)
    bytes_accessed = 2 * N * E * 4 + sum(
        int(v.size) * v.dtype.itemsize for v in packed.values())

    vmem = pl.BlockSpec(memory_space=pltpu.MemorySpace.VMEM)   # whole array, resident

    out = pl.pallas_call(
        kernel,
        out_shape=jax.ShapeDtypeStruct((N, E), x.dtype),
        in_specs=[vmem] * 8,
        out_specs=vmem,
        cost_estimate=pl.CostEstimate(
            flops=flops, transcendentals=transcendentals,
            bytes_accessed=bytes_accessed),
    )(xb, packed["wqkv"], packed["bqkv"], packed["wo"], packed["vecs"],
      packed["w1"], packed["b1"], packed["w2"])

    return out.reshape(B, S, E).transpose(1, 0, 2)


# -----------------------------------------------------------------------------
# Deterministic PyTorch-layout parameter init
# -----------------------------------------------------------------------------
def init_params(key, input_dim, hidden_dim, num_layers):
    params = []
    for _ in range(num_layers):
        key, *ks = jax.random.split(key, 9)
        s = 0.1
        params.append({
            "in_proj_weight": s * jax.random.normal(ks[0], (3 * input_dim, input_dim), jnp.float32),
            "in_proj_bias":   s * jax.random.normal(ks[1], (3 * input_dim,), jnp.float32),
            "w_o":   s * jax.random.normal(ks[2], (input_dim, input_dim), jnp.float32),
            "b_o":   s * jax.random.normal(ks[3], (input_dim,), jnp.float32),
            "g1":    jnp.ones((input_dim,), jnp.float32),
            "beta1": jnp.zeros((input_dim,), jnp.float32),
            "w1":    s * jax.random.normal(ks[4], (hidden_dim, input_dim), jnp.float32),
            "b1":    s * jax.random.normal(ks[5], (hidden_dim,), jnp.float32),
            "w2":    s * jax.random.normal(ks[6], (input_dim, hidden_dim), jnp.float32),
            "b2":    s * jax.random.normal(ks[7], (input_dim,), jnp.float32),
            "g2":    jnp.ones((input_dim,), jnp.float32),
            "beta2": jnp.zeros((input_dim,), jnp.float32),
        })
    return params


# -----------------------------------------------------------------------------
# Pure-JAX f32 reference (PyTorch semantics) for correctness cross-check
# -----------------------------------------------------------------------------
def reference_block(x, params, num_heads):
    S, B, E = x.shape
    hd = E // num_heads
    eps = 1e-5
    xb = jnp.transpose(x, (1, 0, 2))            # (B, S, E)
    for p in params:
        qkv = jnp.einsum("bse,fe->bsf", xb, p["in_proj_weight"]) + p["in_proj_bias"]
        q, k, v = qkv[..., :E], qkv[..., E:2 * E], qkv[..., 2 * E:]
        q = q.reshape(B, S, num_heads, hd) / math.sqrt(hd)
        k = k.reshape(B, S, num_heads, hd)
        v = v.reshape(B, S, num_heads, hd)
        s = jnp.einsum("bqhd,bkhd->bhqk", q, k)
        a = jax.nn.softmax(s, axis=-1)
        o = jnp.einsum("bhqk,bkhd->bqhd", a, v).reshape(B, S, E)
        o = jnp.einsum("bse,fe->bsf", o, p["w_o"]) + p["b_o"]
        x1 = xb + o
        mu = jnp.mean(x1, -1, keepdims=True)
        var = jnp.mean((x1 - mu) ** 2, -1, keepdims=True)
        x1n = (x1 - mu) * lax.rsqrt(var + eps) * p["g1"] + p["beta1"]
        h = jnp.maximum(jnp.einsum("bse,he->bsh", x1n, p["w1"]) + p["b1"], 0.0)
        ff = jnp.einsum("bsh,eh->bse", h, p["w2"]) + p["b2"]
        x2 = x1n + ff
        mu2 = jnp.mean(x2, -1, keepdims=True)
        var2 = jnp.mean((x2 - mu2) ** 2, -1, keepdims=True)
        xb = (x2 - mu2) * lax.rsqrt(var2 + eps) * p["g2"] + p["beta2"]
    return jnp.transpose(xb, (1, 0, 2))


if __name__ == "__main__":
    # Shapes consistent with the module's forward:
    #   input_dim (embed) = 32, num_heads = 4, hidden_dim = 64, num_layers = 2
    #   seq S = 8, batch B = 2  ->  x: (S, B, E) = (8, 2, 32)
    input_dim, num_heads, hidden_dim, num_layers = 32, 4, 64, 2
    S, B = 8, 2

    key = jax.random.PRNGKey(0)
    key, xkey = jax.random.split(key)
    x = jax.random.normal(xkey, (S, B, input_dim), jnp.float32)
    params = init_params(key, input_dim, hidden_dim, num_layers)
    packed = pack_params(params, num_heads)

    out = transformer_encoder_block(x, packed, num_heads=num_heads)
    out = jax.block_until_ready(out)

    ref = jax.block_until_ready(reference_block(x, params, num_heads))
    assert out.shape == (S, B, input_dim)
    # Tolerance accounts for bf16 MXU operands (f32 accumulation).
    assert jnp.allclose(out, ref, atol=2e-2, rtol=2e-2), float(jnp.max(jnp.abs(out - ref)))

    print("KERNEL_OK")
</pallas_src>

<mosaic_0001>
module attributes {stable_mosaic.version = 11 : i64} {
  func.func @fused_encoder_kernel(%arg0: memref<16x32xf32, #tpu.memory_space<vmem>>, %arg1: memref<2x32x96xbf16, #tpu.memory_space<vmem>>, %arg2: memref<2x1x96xf32, #tpu.memory_space<vmem>>, %arg3: memref<2x32x32xbf16, #tpu.memory_space<vmem>>, %arg4: memref<2x6x32xf32, #tpu.memory_space<vmem>>, %arg5: memref<2x32x64xbf16, #tpu.memory_space<vmem>>, %arg6: memref<2x1x64xf32, #tpu.memory_space<vmem>>, %arg7: memref<2x64x32xbf16, #tpu.memory_space<vmem>>, %arg8: memref<16x32xf32, #tpu.memory_space<vmem>>) attributes {dimension_semantics = [], scalar_prefetch = 0 : i64, scratch_operands = 0 : i64, tpu.core_type = #tpu.core_type<tc>} {
    %c0 = arith.constant 0 : index
    %c0_0 = arith.constant 0 : index
    %0 = vector.load %arg0[%c0, %c0_0] : memref<16x32xf32, #tpu.memory_space<vmem>>, vector<16x32xf32>
    %c0_1 = arith.constant 0 : index
    %c0_2 = arith.constant 0 : index
    %c0_3 = arith.constant 0 : index
    %1 = vector.load %arg1[%c0_1, %c0_2, %c0_3] : memref<2x32x96xbf16, #tpu.memory_space<vmem>>, vector<1x32x96xbf16>
    %2 = vector.shape_cast %1 : vector<1x32x96xbf16> to vector<32x96xbf16>
    %c0_4 = arith.constant 0 : index
    %c0_5 = arith.constant 0 : index
    %c0_6 = arith.constant 0 : index
    %3 = vector.load %arg2[%c0_4, %c0_5, %c0_6] : memref<2x1x96xf32, #tpu.memory_space<vmem>>, vector<1x1x96xf32>
    %4 = vector.shape_cast %3 : vector<1x1x96xf32> to vector<1x96xf32>
    %c0_7 = arith.constant 0 : index
    %c0_8 = arith.constant 0 : index
    %c0_9 = arith.constant 0 : index
    %5 = vector.load %arg3[%c0_7, %c0_8, %c0_9] : memref<2x32x32xbf16, #tpu.memory_space<vmem>>, vector<1x32x32xbf16>
    %6 = vector.shape_cast %5 : vector<1x32x32xbf16> to vector<32x32xbf16>
    %c0_10 = arith.constant 0 : index
    %c0_11 = arith.constant 0 : index
    %c0_12 = arith.constant 0 : index
    %7 = vector.load %arg4[%c0_10, %c0_11, %c0_12] : memref<2x6x32xf32, #tpu.memory_space<vmem>>, vector<1x6x32xf32>
    %8 = vector.shape_cast %7 : vector<1x6x32xf32> to vector<6x32xf32>
    %c0_13 = arith.constant 0 : index
    %c0_14 = arith.constant 0 : index
    %c0_15 = arith.constant 0 : index
    %9 = vector.load %arg5[%c0_13, %c0_14, %c0_15] : memref<2x32x64xbf16, #tpu.memory_space<vmem>>, vector<1x32x64xbf16>
    %10 = vector.shape_cast %9 : vector<1x32x64xbf16> to vector<32x64xbf16>
    %c0_16 = arith.constant 0 : index
    %c0_17 = arith.constant 0 : index
    %c0_18 = arith.constant 0 : index
    %11 = vector.load %arg6[%c0_16, %c0_17, %c0_18] : memref<2x1x64xf32, #tpu.memory_space<vmem>>, vector<1x1x64xf32>
    %12 = vector.shape_cast %11 : vector<1x1x64xf32> to vector<1x64xf32>
    %c0_19 = arith.constant 0 : index
    %c0_20 = arith.constant 0 : index
    %c0_21 = arith.constant 0 : index
    %13 = vector.load %arg7[%c0_19, %c0_20, %c0_21] : memref<2x64x32xbf16, #tpu.memory_space<vmem>>, vector<1x64x32xbf16>
    %14 = vector.shape_cast %13 : vector<1x64x32xbf16> to vector<64x32xbf16>
    %15 = vector.extract_strided_slice %8 {offsets = [0, 0], sizes = [1, 32], strides = [1, 1]} : vector<6x32xf32> to vector<1x32xf32>
    %16 = vector.extract_strided_slice %8 {offsets = [1, 0], sizes = [1, 32], strides = [1, 1]} : vector<6x32xf32> to vector<1x32xf32>
    %17 = vector.extract_strided_slice %8 {offsets = [2, 0], sizes = [1, 32], strides = [1, 1]} : vector<6x32xf32> to vector<1x32xf32>
    %18 = vector.extract_strided_slice %8 {offsets = [3, 0], sizes = [1, 32], strides = [1, 1]} : vector<6x32xf32> to vector<1x32xf32>
    %19 = vector.extract_strided_slice %8 {offsets = [4, 0], sizes = [1, 32], strides = [1, 1]} : vector<6x32xf32> to vector<1x32xf32>
    %20 = vector.extract_strided_slice %8 {offsets = [5, 0], sizes = [1, 32], strides = [1, 1]} : vector<6x32xf32> to vector<1x32xf32>
    %21 = arith.truncf %0 : vector<16x32xf32> to vector<16x32xbf16>
    %cst = arith.constant dense<0.000000e+00> : vector<16x96xf32>
    %22 = tpu.matmul %21, %2, %cst {dimension_numbers = #tpu.dot_dimension_numbers<[1], [0], [0], [1], [0, 0, 1, 1], [], []>} : vector<16x32xbf16>, vector<32x96xbf16>, vector<16x96xf32> -> vector<16x96xf32>
    %23 = vector.broadcast %4 : vector<1x96xf32> to vector<16x96xf32>
    %24 = arith.addf %22, %23 : vector<16x96xf32>
    %25 = vector.extract_strided_slice %24 {offsets = [0, 0], sizes = [16, 8], strides = [1, 1]} : vector<16x96xf32> to vector<16x8xf32>
    %26 = vector.shape_cast %25 : vector<16x8xf32> to vector<2x8x8xf32>
    %27 = vector.extract_strided_slice %24 {offsets = [0, 8], sizes = [16, 8], strides = [1, 1]} : vector<16x96xf32> to vector<16x8xf32>
    %28 = vector.shape_cast %27 : vector<16x8xf32> to vector<2x8x8xf32>
    %29 = vector.extract_strided_slice %24 {offsets = [0, 16], sizes = [16, 8], strides = [1, 1]} : vector<16x96xf32> to vector<16x8xf32>
    %30 = vector.shape_cast %29 : vector<16x8xf32> to vector<2x8x8xf32>
    %31 = vector.extract_strided_slice %24 {offsets = [0, 24], sizes = [16, 8], strides = [1, 1]} : vector<16x96xf32> to vector<16x8xf32>
    %32 = vector.shape_cast %31 : vector<16x8xf32> to vector<2x8x8xf32>
    %33 = tpu.concatenate %26, %28, %30, %32 in 0 : vector<2x8x8xf32>, vector<2x8x8xf32>, vector<2x8x8xf32>, vector<2x8x8xf32> -> vector<8x8x8xf32>
    %34 = arith.truncf %33 : vector<8x8x8xf32> to vector<8x8x8xbf16>
    %35 = vector.extract_strided_slice %24 {offsets = [0, 32], sizes = [16, 8], strides = [1, 1]} : vector<16x96xf32> to vector<16x8xf32>
    %36 = vector.shape_cast %35 : vector<16x8xf32> to vector<2x8x8xf32>
    %37 = vector.extract_strided_slice %24 {offsets = [0, 40], sizes = [16, 8], strides = [1, 1]} : vector<16x96xf32> to vector<16x8xf32>
    %38 = vector.shape_cast %37 : vector<16x8xf32> to vector<2x8x8xf32>
    %39 = vector.extract_strided_slice %24 {offsets = [0, 48], sizes = [16, 8], strides = [1, 1]} : vector<16x96xf32> to vector<16x8xf32>
    %40 = vector.shape_cast %39 : vector<16x8xf32> to vector<2x8x8xf32>
    %41 = vector.extract_strided_slice %24 {offsets = [0, 56], sizes = [16, 8], strides = [1, 1]} : vector<16x96xf32> to vector<16x8xf32>
    %42 = vector.shape_cast %41 : vector<16x8xf32> to vector<2x8x8xf32>
    %43 = tpu.concatenate %36, %38, %40, %42 in 0 : vector<2x8x8xf32>, vector<2x8x8xf32>, vector<2x8x8xf32>, vector<2x8x8xf32> -> vector<8x8x8xf32>
    %44 = arith.truncf %43 : vector<8x8x8xf32> to vector<8x8x8xbf16>
    %45 = vector.extract_strided_slice %24 {offsets = [0, 64], sizes = [16, 8], strides = [1, 1]} : vector<16x96xf32> to vector<16x8xf32>
    %46 = vector.shape_cast %45 : vector<16x8xf32> to vector<2x8x8xf32>
    %47 = vector.extract_strided_slice %24 {offsets = [0, 72], sizes = [16, 8], strides = [1, 1]} : vector<16x96xf32> to vector<16x8xf32>
    %48 = vector.shape_cast %47 : vector<16x8xf32> to vector<2x8x8xf32>
    %49 = vector.extract_strided_slice %24 {offsets = [0, 80], sizes = [16, 8], strides = [1, 1]} : vector<16x96xf32> to vector<16x8xf32>
    %50 = vector.shape_cast %49 : vector<16x8xf32> to vector<2x8x8xf32>
    %51 = vector.extract_strided_slice %24 {offsets = [0, 88], sizes = [16, 8], strides = [1, 1]} : vector<16x96xf32> to vector<16x8xf32>
    %52 = vector.shape_cast %51 : vector<16x8xf32> to vector<2x8x8xf32>
    %53 = tpu.concatenate %46, %48, %50, %52 in 0 : vector<2x8x8xf32>, vector<2x8x8xf32>, vector<2x8x8xf32>, vector<2x8x8xf32> -> vector<8x8x8xf32>
    %54 = arith.truncf %53 : vector<8x8x8xf32> to vector<8x8x8xbf16>
    "tpu.trace_start"() <{level = 10 : i32, message = "gqd,gkd->gqk"}> : () -> ()
    %cst_22 = arith.constant dense<0.000000e+00> : vector<8x8x8xf32>
    %55 = tpu.matmul %34, %44, %cst_22 {dimension_numbers = #tpu.dot_dimension_numbers<[2], [2], [1], [1], [0, 0, 0, 1, 1, 1], [0], [0]>} : vector<8x8x8xbf16>, vector<8x8x8xbf16>, vector<8x8x8xf32> -> vector<8x8x8xf32>
    "tpu.trace_stop"() : () -> ()
    %cst_23 = arith.constant dense<0xFF800000> : vector<8x8xf32>
    %56 = vector.multi_reduction <maximumf>, %55, %cst_23 [2] : vector<8x8x8xf32> to vector<8x8xf32>
    %57 = vector.shape_cast %56 : vector<8x8xf32> to vector<8x8x1xf32>
    %58 = vector.broadcast %57 : vector<8x8x1xf32> to vector<8x8x8xf32>
    %59 = arith.subf %55, %58 : vector<8x8x8xf32>
    %60 = math.exp %59 : vector<8x8x8xf32>
    %cst_24 = arith.constant dense<0.000000e+00> : vector<8x8xf32>
    %61 = vector.multi_reduction <add>, %60, %cst_24 [2] : vector<8x8x8xf32> to vector<8x8xf32>
    %62 = vector.shape_cast %61 : vector<8x8xf32> to vector<8x8x1xf32>
    %63 = vector.broadcast %62 : vector<8x8x1xf32> to vector<8x8x8xf32>
    %64 = arith.divf %60, %63 : vector<8x8x8xf32>
    %65 = arith.truncf %64 : vector<8x8x8xf32> to vector<8x8x8xbf16>
    "tpu.trace_start"() <{level = 10 : i32, message = "gqk,gkd->gqd"}> : () -> ()
    %cst_25 = arith.constant dense<0.000000e+00> : vector<8x8x8xf32>
    %66 = tpu.matmul %65, %54, %cst_25 {dimension_numbers = #tpu.dot_dimension_numbers<[2], [1], [1], [2], [0, 0, 0, 1, 1, 2], [0], [0]>} : vector<8x8x8xbf16>, vector<8x8x8xbf16>, vector<8x8x8xf32> -> vector<8x8x8xf32>
    "tpu.trace_stop"() : () -> ()
    %67 = vector.extract_strided_slice %66 {offsets = [0, 0, 0], sizes = [2, 8, 8], strides = [1, 1, 1]} : vector<8x8x8xf32> to vector<2x8x8xf32>
    %68 = vector.shape_cast %67 : vector<2x8x8xf32> to vector<16x8xf32>
    %69 = vector.extract_strided_slice %66 {offsets = [2, 0, 0], sizes = [2, 8, 8], strides = [1, 1, 1]} : vector<8x8x8xf32> to vector<2x8x8xf32>
    %70 = vector.shape_cast %69 : vector<2x8x8xf32> to vector<16x8xf32>
    %71 = vector.extract_strided_slice %66 {offsets = [4, 0, 0], sizes = [2, 8, 8], strides = [1, 1, 1]} : vector<8x8x8xf32> to vector<2x8x8xf32>
    %72 = vector.shape_cast %71 : vector<2x8x8xf32> to vector<16x8xf32>
    %73 = vector.extract_strided_slice %66 {offsets = [6, 0, 0], sizes = [2, 8, 8], strides = [1, 1, 1]} : vector<8x8x8xf32> to vector<2x8x8xf32>
    %74 = vector.shape_cast %73 : vector<2x8x8xf32> to vector<16x8xf32>
    %75 = tpu.concatenate %68, %70, %72, %74 in 1 : vector<16x8xf32>, vector<16x8xf32>, vector<16x8xf32>, vector<16x8xf32> -> vector<16x32xf32>
    %76 = arith.truncf %75 : vector<16x32xf32> to vector<16x32xbf16>
    %cst_26 = arith.constant dense<0.000000e+00> : vector<16x32xf32>
    %77 = tpu.matmul %76, %6, %cst_26 {dimension_numbers = #tpu.dot_dimension_numbers<[1], [0], [0], [1], [0, 0, 1, 1], [], []>} : vector<16x32xbf16>, vector<32x32xbf16>, vector<16x32xf32> -> vector<16x32xf32>
    %78 = vector.broadcast %15 : vector<1x32xf32> to vector<16x32xf32>
    %79 = arith.addf %77, %78 : vector<16x32xf32>
    %80 = arith.addf %0, %79 : vector<16x32xf32>
    %cst_27 = arith.constant dense<0.000000e+00> : vector<16xf32>
    %81 = vector.multi_reduction <add>, %80, %cst_27 [1] : vector<16x32xf32> to vector<16xf32>
    %82 = vector.shape_cast %81 : vector<16xf32> to vector<16x1xf32>
    %cst_28 = arith.constant 3.200000e+01 : f32
    %83 = vector.broadcast %cst_28 : f32 to vector<16x1xf32>
    %84 = arith.divf %82, %83 : vector<16x1xf32>
    %85 = vector.broadcast %84 : vector<16x1xf32> to vector<16x32xf32>
    %86 = arith.subf %80, %85 : vector<16x32xf32>
    %87 = arith.mulf %86, %86 : vector<16x32xf32>
    %cst_29 = arith.constant dense<0.000000e+00> : vector<16xf32>
    %88 = vector.multi_reduction <add>, %87, %cst_29 [1] : vector<16x32xf32> to vector<16xf32>
    %89 = vector.shape_cast %88 : vector<16xf32> to vector<16x1xf32>
    %cst_30 = arith.constant 3.200000e+01 : f32
    %90 = vector.broadcast %cst_30 : f32 to vector<16x1xf32>
    %91 = arith.divf %89, %90 : vector<16x1xf32>
    %92 = vector.broadcast %84 : vector<16x1xf32> to vector<16x32xf32>
    %93 = arith.subf %80, %92 : vector<16x32xf32>
    %cst_31 = arith.constant 9.99999974E-6 : f32
    %94 = vector.broadcast %cst_31 : f32 to vector<16x1xf32>
    %95 = arith.addf %91, %94 : vector<16x1xf32>
    %96 = math.rsqrt %95 : vector<16x1xf32>
    %97 = vector.broadcast %96 : vector<16x1xf32> to vector<16x32xf32>
    %98 = arith.mulf %93, %97 : vector<16x32xf32>
    %99 = vector.broadcast %16 : vector<1x32xf32> to vector<16x32xf32>
    %100 = arith.mulf %98, %99 : vector<16x32xf32>
    %101 = vector.broadcast %17 : vector<1x32xf32> to vector<16x32xf32>
    %102 = arith.addf %100, %101 : vector<16x32xf32>
    %103 = arith.truncf %102 : vector<16x32xf32> to vector<16x32xbf16>
    %cst_32 = arith.constant dense<0.000000e+00> : vector<16x64xf32>
    %104 = tpu.matmul %103, %10, %cst_32 {dimension_numbers = #tpu.dot_dimension_numbers<[1], [0], [0], [1], [0, 0, 1, 1], [], []>} : vector<16x32xbf16>, vector<32x64xbf16>, vector<16x64xf32> -> vector<16x64xf32>
    %105 = vector.broadcast %12 : vector<1x64xf32> to vector<16x64xf32>
    %106 = arith.addf %104, %105 : vector<16x64xf32>
    %cst_33 = arith.constant 0.000000e+00 : f32
    %107 = vector.broadcast %cst_33 : f32 to vector<16x64xf32>
    %108 = arith.maximumf %106, %107 : vector<16x64xf32>
    %109 = arith.truncf %108 : vector<16x64xf32> to vector<16x64xbf16>
    %cst_34 = arith.constant dense<0.000000e+00> : vector<16x32xf32>
    %110 = tpu.matmul %109, %14, %cst_34 {dimension_numbers = #tpu.dot_dimension_numbers<[1], [0], [0], [1], [0, 0, 1, 1], [], []>} : vector<16x64xbf16>, vector<64x32xbf16>, vector<16x32xf32> -> vector<16x32xf32>
    %111 = vector.broadcast %18 : vector<1x32xf32> to vector<16x32xf32>
    %112 = arith.addf %110, %111 : vector<16x32xf32>
    %113 = arith.addf %102, %112 : vector<16x32xf32>
    %cst_35 = arith.constant dense<0.000000e+00> : vector<16xf32>
    %114 = vector.multi_reduction <add>, %113, %cst_35 [1] : vector<16x32xf32> to vector<16xf32>
    %115 = vector.shape_cast %114 : vector<16xf32> to vector<16x1xf32>
    %cst_36 = arith.constant 3.200000e+01 : f32
    %116 = vector.broadcast %cst_36 : f32 to vector<16x1xf32>
    %117 = arith.divf %115, %116 : vector<16x1xf32>
    %118 = vector.broadcast %117 : vector<16x1xf32> to vector<16x32xf32>
    %119 = arith.subf %113, %118 : vector<16x32xf32>
    %120 = arith.mulf %119, %119 : vector<16x32xf32>
    %cst_37 = arith.constant dense<0.000000e+00> : vector<16xf32>
    %121 = vector.multi_reduction <add>, %120, %cst_37 [1] : vector<16x32xf32> to vector<16xf32>
    %122 = vector.shape_cast %121 : vector<16xf32> to vector<16x1xf32>
    %cst_38 = arith.constant 3.200000e+01 : f32
    %123 = vector.broadcast %cst_38 : f32 to vector<16x1xf32>
    %124 = arith.divf %122, %123 : vector<16x1xf32>
    %125 = vector.broadcast %117 : vector<16x1xf32> to vector<16x32xf32>
    %126 = arith.subf %113, %125 : vector<16x32xf32>
    %cst_39 = arith.constant 9.99999974E-6 : f32
    %127 = vector.broadcast %cst_39 : f32 to vector<16x1xf32>
    %128 = arith.addf %124, %127 : vector<16x1xf32>
    %129 = math.rsqrt %128 : vector<16x1xf32>
    %130 = vector.broadcast %129 : vector<16x1xf32> to vector<16x32xf32>
    %131 = arith.mulf %126, %130 : vector<16x32xf32>
    %132 = vector.broadcast %19 : vector<1x32xf32> to vector<16x32xf32>
    %133 = arith.mulf %131, %132 : vector<16x32xf32>
    %134 = vector.broadcast %20 : vector<1x32xf32> to vector<16x32xf32>
    %135 = arith.addf %133, %134 : vector<16x32xf32>
    %c1 = arith.constant 1 : index
    %c0_40 = arith.constant 0 : index
    %c0_41 = arith.constant 0 : index
    %136 = vector.load %arg1[%c1, %c0_40, %c0_41] : memref<2x32x96xbf16, #tpu.memory_space<vmem>>, vector<1x32x96xbf16>
    %137 = vector.shape_cast %136 : vector<1x32x96xbf16> to vector<32x96xbf16>
    %c1_42 = arith.constant 1 : index
    %c0_43 = arith.constant 0 : index
    %c0_44 = arith.constant 0 : index
    %138 = vector.load %arg2[%c1_42, %c0_43, %c0_44] : memref<2x1x96xf32, #tpu.memory_space<vmem>>, vector<1x1x96xf32>
    %139 = vector.shape_cast %138 : vector<1x1x96xf32> to vector<1x96xf32>
    %c1_45 = arith.constant 1 : index
    %c0_46 = arith.constant 0 : index
    %c0_47 = arith.constant 0 : index
    %140 = vector.load %arg3[%c1_45, %c0_46, %c0_47] : memref<2x32x32xbf16, #tpu.memory_space<vmem>>, vector<1x32x32xbf16>
    %141 = vector.shape_cast %140 : vector<1x32x32xbf16> to vector<32x32xbf16>
    %c1_48 = arith.constant 1 : index
    %c0_49 = arith.constant 0 : index
    %c0_50 = arith.constant 0 : index
    %142 = vector.load %arg4[%c1_48, %c0_49, %c0_50] : memref<2x6x32xf32, #tpu.memory_space<vmem>>, vector<1x6x32xf32>
    %143 = vector.shape_cast %142 : vector<1x6x32xf32> to vector<6x32xf32>
    %c1_51 = arith.constant 1 : index
    %c0_52 = arith.constant 0 : index
    %c0_53 = arith.constant 0 : index
    %144 = vector.load %arg5[%c1_51, %c0_52, %c0_53] : memref<2x32x64xbf16, #tpu.memory_space<vmem>>, vector<1x32x64xbf16>
    %145 = vector.shape_cast %144 : vector<1x32x64xbf16> to vector<32x64xbf16>
    %c1_54 = arith.constant 1 : index
    %c0_55 = arith.constant 0 : index
    %c0_56 = arith.constant 0 : index
    %146 = vector.load %arg6[%c1_54, %c0_55, %c0_56] : memref<2x1x64xf32, #tpu.memory_space<vmem>>, vector<1x1x64xf32>
    %147 = vector.shape_cast %146 : vector<1x1x64xf32> to vector<1x64xf32>
    %c1_57 = arith.constant 1 : index
    %c0_58 = arith.constant 0 : index
    %c0_59 = arith.constant 0 : index
    %148 = vector.load %arg7[%c1_57, %c0_58, %c0_59] : memref<2x64x32xbf16, #tpu.memory_space<vmem>>, vector<1x64x32xbf16>
    %149 = vector.shape_cast %148 : vector<1x64x32xbf16> to vector<64x32xbf16>
    %150 = vector.extract_strided_slice %143 {offsets = [0, 0], sizes = [1, 32], strides = [1, 1]} : vector<6x32xf32> to vector<1x32xf32>
    %151 = vector.extract_strided_slice %143 {offsets = [1, 0], sizes = [1, 32], strides = [1, 1]} : vector<6x32xf32> to vector<1x32xf32>
    %152 = vector.extract_strided_slice %143 {offsets = [2, 0], sizes = [1, 32], strides = [1, 1]} : vector<6x32xf32> to vector<1x32xf32>
    %153 = vector.extract_strided_slice %143 {offsets = [3, 0], sizes = [1, 32], strides = [1, 1]} : vector<6x32xf32> to vector<1x32xf32>
    %154 = vector.extract_strided_slice %143 {offsets = [4, 0], sizes = [1, 32], strides = [1, 1]} : vector<6x32xf32> to vector<1x32xf32>
    %155 = vector.extract_strided_slice %143 {offsets = [5, 0], sizes = [1, 32], strides = [1, 1]} : vector<6x32xf32> to vector<1x32xf32>
    %156 = arith.truncf %135 : vector<16x32xf32> to vector<16x32xbf16>
    %cst_60 = arith.constant dense<0.000000e+00> : vector<16x96xf32>
    %157 = tpu.matmul %156, %137, %cst_60 {dimension_numbers = #tpu.dot_dimension_numbers<[1], [0], [0], [1], [0, 0, 1, 1], [], []>} : vector<16x32xbf16>, vector<32x96xbf16>, vector<16x96xf32> -> vector<16x96xf32>
    %158 = vector.broadcast %139 : vector<1x96xf32> to vector<16x96xf32>
    %159 = arith.addf %157, %158 : vector<16x96xf32>
    %160 = vector.extract_strided_slice %159 {offsets = [0, 0], sizes = [16, 8], strides = [1, 1]} : vector<16x96xf32> to vector<16x8xf32>
    %161 = vector.shape_cast %160 : vector<16x8xf32> to vector<2x8x8xf32>
    %162 = vector.extract_strided_slice %159 {offsets = [0, 8], sizes = [16, 8], strides = [1, 1]} : vector<16x96xf32> to vector<16x8xf32>
    %163 = vector.shape_cast %162 : vector<16x8xf32> to vector<2x8x8xf32>
    %164 = vector.extract_strided_slice %159 {offsets = [0, 16], sizes = [16, 8], strides = [1, 1]} : vector<16x96xf32> to vector<16x8xf32>
    %165 = vector.shape_cast %164 : vector<16x8xf32> to vector<2x8x8xf32>
    %166 = vector.extract_strided_slice %159 {offsets = [0, 24], sizes = [16, 8], strides = [1, 1]} : vector<16x96xf32> to vector<16x8xf32>
    %167 = vector.shape_cast %166 : vector<16x8xf32> to vector<2x8x8xf32>
    %168 = tpu.concatenate %161, %163, %165, %167 in 0 : vector<2x8x8xf32>, vector<2x8x8xf32>, vector<2x8x8xf32>, vector<2x8x8xf32> -> vector<8x8x8xf32>
    %169 = arith.truncf %168 : vector<8x8x8xf32> to vector<8x8x8xbf16>
    %170 = vector.extract_strided_slice %159 {offsets = [0, 32], sizes = [16, 8], strides = [1, 1]} : vector<16x96xf32> to vector<16x8xf32>
    %171 = vector.shape_cast %170 : vector<16x8xf32> to vector<2x8x8xf32>
    %172 = vector.extract_strided_slice %159 {offsets = [0, 40], sizes = [16, 8], strides = [1, 1]} : vector<16x96xf32> to vector<16x8xf32>
    %173 = vector.shape_cast %172 : vector<16x8xf32> to vector<2x8x8xf32>
    %174 = vector.extract_strided_slice %159 {offsets = [0, 48], sizes = [16, 8], strides = [1, 1]} : vector<16x96xf32> to vector<16x8xf32>
    %175 = vector.shape_cast %174 : vector<16x8xf32> to vector<2x8x8xf32>
    %176 = vector.extract_strided_slice %159 {offsets = [0, 56], sizes = [16, 8], strides = [1, 1]} : vector<16x96xf32> to vector<16x8xf32>
    %177 = vector.shape_cast %176 : vector<16x8xf32> to vector<2x8x8xf32>
    %178 = tpu.concatenate %171, %173, %175, %177 in 0 : vector<2x8x8xf32>, vector<2x8x8xf32>, vector<2x8x8xf32>, vector<2x8x8xf32> -> vector<8x8x8xf32>
    %179 = arith.truncf %178 : vector<8x8x8xf32> to vector<8x8x8xbf16>
    %180 = vector.extract_strided_slice %159 {offsets = [0, 64], sizes = [16, 8], strides = [1, 1]} : vector<16x96xf32> to vector<16x8xf32>
    %181 = vector.shape_cast %180 : vector<16x8xf32> to vector<2x8x8xf32>
    %182 = vector.extract_strided_slice %159 {offsets = [0, 72], sizes = [16, 8], strides = [1, 1]} : vector<16x96xf32> to vector<16x8xf32>
    %183 = vector.shape_cast %182 : vector<16x8xf32> to vector<2x8x8xf32>
    %184 = vector.extract_strided_slice %159 {offsets = [0, 80], sizes = [16, 8], strides = [1, 1]} : vector<16x96xf32> to vector<16x8xf32>
    %185 = vector.shape_cast %184 : vector<16x8xf32> to vector<2x8x8xf32>
    %186 = vector.extract_strided_slice %159 {offsets = [0, 88], sizes = [16, 8], strides = [1, 1]} : vector<16x96xf32> to vector<16x8xf32>
    %187 = vector.shape_cast %186 : vector<16x8xf32> to vector<2x8x8xf32>
    %188 = tpu.concatenate %181, %183, %185, %187 in 0 : vector<2x8x8xf32>, vector<2x8x8xf32>, vector<2x8x8xf32>, vector<2x8x8xf32> -> vector<8x8x8xf32>
    %189 = arith.truncf %188 : vector<8x8x8xf32> to vector<8x8x8xbf16>
    "tpu.trace_start"() <{level = 10 : i32, message = "gqd,gkd->gqk"}> : () -> ()
    %cst_61 = arith.constant dense<0.000000e+00> : vector<8x8x8xf32>
    %190 = tpu.matmul %169, %179, %cst_61 {dimension_numbers = #tpu.dot_dimension_numbers<[2], [2], [1], [1], [0, 0, 0, 1, 1, 1], [0], [0]>} : vector<8x8x8xbf16>, vector<8x8x8xbf16>, vector<8x8x8xf32> -> vector<8x8x8xf32>
    "tpu.trace_stop"() : () -> ()
    %cst_62 = arith.constant dense<0xFF800000> : vector<8x8xf32>
    %191 = vector.multi_reduction <maximumf>, %190, %cst_62 [2] : vector<8x8x8xf32> to vector<8x8xf32>
    %192 = vector.shape_cast %191 : vector<8x8xf32> to vector<8x8x1xf32>
    %193 = vector.broadcast %192 : vector<8x8x1xf32> to vector<8x8x8xf32>
    %194 = arith.subf %190, %193 : vector<8x8x8xf32>
    %195 = math.exp %194 : vector<8x8x8xf32>
    %cst_63 = arith.constant dense<0.000000e+00> : vector<8x8xf32>
    %196 = vector.multi_reduction <add>, %195, %cst_63 [2] : vector<8x8x8xf32> to vector<8x8xf32>
    %197 = vector.shape_cast %196 : vector<8x8xf32> to vector<8x8x1xf32>
    %198 = vector.broadcast %197 : vector<8x8x1xf32> to vector<8x8x8xf32>
    %199 = arith.divf %195, %198 : vector<8x8x8xf32>
    %200 = arith.truncf %199 : vector<8x8x8xf32> to vector<8x8x8xbf16>
    "tpu.trace_start"() <{level = 10 : i32, message = "gqk,gkd->gqd"}> : () -> ()
    %cst_64 = arith.constant dense<0.000000e+00> : vector<8x8x8xf32>
    %201 = tpu.matmul %200, %189, %cst_64 {dimension_numbers = #tpu.dot_dimension_numbers<[2], [1], [1], [2], [0, 0, 0, 1, 1, 2], [0], [0]>} : vector<8x8x8xbf16>, vector<8x8x8xbf16>, vector<8x8x8xf32> -> vector<8x8x8xf32>
    "tpu.trace_stop"() : () -> ()
    %202 = vector.extract_strided_slice %201 {offsets = [0, 0, 0], sizes = [2, 8, 8], strides = [1, 1, 1]} : vector<8x8x8xf32> to vector<2x8x8xf32>
    %203 = vector.shape_cast %202 : vector<2x8x8xf32> to vector<16x8xf32>
    %204 = vector.extract_strided_slice %201 {offsets = [2, 0, 0], sizes = [2, 8, 8], strides = [1, 1, 1]} : vector<8x8x8xf32> to vector<2x8x8xf32>
    %205 = vector.shape_cast %204 : vector<2x8x8xf32> to vector<16x8xf32>
    %206 = vector.extract_strided_slice %201 {offsets = [4, 0, 0], sizes = [2, 8, 8], strides = [1, 1, 1]} : vector<8x8x8xf32> to vector<2x8x8xf32>
    %207 = vector.shape_cast %206 : vector<2x8x8xf32> to vector<16x8xf32>
    %208 = vector.extract_strided_slice %201 {offsets = [6, 0, 0], sizes = [2, 8, 8], strides = [1, 1, 1]} : vector<8x8x8xf32> to vector<2x8x8xf32>
    %209 = vector.shape_cast %208 : vector<2x8x8xf32> to vector<16x8xf32>
    %210 = tpu.concatenate %203, %205, %207, %209 in 1 : vector<16x8xf32>, vector<16x8xf32>, vector<16x8xf32>, vector<16x8xf32> -> vector<16x32xf32>
    %211 = arith.truncf %210 : vector<16x32xf32> to vector<16x32xbf16>
    %cst_65 = arith.constant dense<0.000000e+00> : vector<16x32xf32>
    %212 = tpu.matmul %211, %141, %cst_65 {dimension_numbers = #tpu.dot_dimension_numbers<[1], [0], [0], [1], [0, 0, 1, 1], [], []>} : vector<16x32xbf16>, vector<32x32xbf16>, vector<16x32xf32> -> vector<16x32xf32>
    %213 = vector.broadcast %150 : vector<1x32xf32> to vector<16x32xf32>
    %214 = arith.addf %212, %213 : vector<16x32xf32>
    %215 = arith.addf %135, %214 : vector<16x32xf32>
    %cst_66 = arith.constant dense<0.000000e+00> : vector<16xf32>
    %216 = vector.multi_reduction <add>, %215, %cst_66 [1] : vector<16x32xf32> to vector<16xf32>
    %217 = vector.shape_cast %216 : vector<16xf32> to vector<16x1xf32>
    %cst_67 = arith.constant 3.200000e+01 : f32
    %218 = vector.broadcast %cst_67 : f32 to vector<16x1xf32>
    %219 = arith.divf %217, %218 : vector<16x1xf32>
    %220 = vector.broadcast %219 : vector<16x1xf32> to vector<16x32xf32>
    %221 = arith.subf %215, %220 : vector<16x32xf32>
    %222 = arith.mulf %221, %221 : vector<16x32xf32>
    %cst_68 = arith.constant dense<0.000000e+00> : vector<16xf32>
    %223 = vector.multi_reduction <add>, %222, %cst_68 [1] : vector<16x32xf32> to vector<16xf32>
    %224 = vector.shape_cast %223 : vector<16xf32> to vector<16x1xf32>
    %cst_69 = arith.constant 3.200000e+01 : f32
    %225 = vector.broadcast %cst_69 : f32 to vector<16x1xf32>
    %226 = arith.divf %224, %225 : vector<16x1xf32>
    %227 = vector.broadcast %219 : vector<16x1xf32> to vector<16x32xf32>
    %228 = arith.subf %215, %227 : vector<16x32xf32>
    %cst_70 = arith.constant 9.99999974E-6 : f32
    %229 = vector.broadcast %cst_70 : f32 to vector<16x1xf32>
    %230 = arith.addf %226, %229 : vector<16x1xf32>
    %231 = math.rsqrt %230 : vector<16x1xf32>
    %232 = vector.broadcast %231 : vector<16x1xf32> to vector<16x32xf32>
    %233 = arith.mulf %228, %232 : vector<16x32xf32>
    %234 = vector.broadcast %151 : vector<1x32xf32> to vector<16x32xf32>
    %235 = arith.mulf %233, %234 : vector<16x32xf32>
    %236 = vector.broadcast %152 : vector<1x32xf32> to vector<16x32xf32>
    %237 = arith.addf %235, %236 : vector<16x32xf32>
    %238 = arith.truncf %237 : vector<16x32xf32> to vector<16x32xbf16>
    %cst_71 = arith.constant dense<0.000000e+00> : vector<16x64xf32>
    %239 = tpu.matmul %238, %145, %cst_71 {dimension_numbers = #tpu.dot_dimension_numbers<[1], [0], [0], [1], [0, 0, 1, 1], [], []>} : vector<16x32xbf16>, vector<32x64xbf16>, vector<16x64xf32> -> vector<16x64xf32>
    %240 = vector.broadcast %147 : vector<1x64xf32> to vector<16x64xf32>
    %241 = arith.addf %239, %240 : vector<16x64xf32>
    %cst_72 = arith.constant 0.000000e+00 : f32
    %242 = vector.broadcast %cst_72 : f32 to vector<16x64xf32>
    %243 = arith.maximumf %241, %242 : vector<16x64xf32>
    %244 = arith.truncf %243 : vector<16x64xf32> to vector<16x64xbf16>
    %cst_73 = arith.constant dense<0.000000e+00> : vector<16x32xf32>
    %245 = tpu.matmul %244, %149, %cst_73 {dimension_numbers = #tpu.dot_dimension_numbers<[1], [0], [0], [1], [0, 0, 1, 1], [], []>} : vector<16x64xbf16>, vector<64x32xbf16>, vector<16x32xf32> -> vector<16x32xf32>
    %246 = vector.broadcast %153 : vector<1x32xf32> to vector<16x32xf32>
    %247 = arith.addf %245, %246 : vector<16x32xf32>
    %248 = arith.addf %237, %247 : vector<16x32xf32>
    %cst_74 = arith.constant dense<0.000000e+00> : vector<16xf32>
    %249 = vector.multi_reduction <add>, %248, %cst_74 [1] : vector<16x32xf32> to vector<16xf32>
    %250 = vector.shape_cast %249 : vector<16xf32> to vector<16x1xf32>
    %cst_75 = arith.constant 3.200000e+01 : f32
    %251 = vector.broadcast %cst_75 : f32 to vector<16x1xf32>
    %252 = arith.divf %250, %251 : vector<16x1xf32>
    %253 = vector.broadcast %252 : vector<16x1xf32> to vector<16x32xf32>
    %254 = arith.subf %248, %253 : vector<16x32xf32>
    %255 = arith.mulf %254, %254 : vector<16x32xf32>
    %cst_76 = arith.constant dense<0.000000e+00> : vector<16xf32>
    %256 = vector.multi_reduction <add>, %255, %cst_76 [1] : vector<16x32xf32> to vector<16xf32>
    %257 = vector.shape_cast %256 : vector<16xf32> to vector<16x1xf32>
    %cst_77 = arith.constant 3.200000e+01 : f32
    %258 = vector.broadcast %cst_77 : f32 to vector<16x1xf32>
    %259 = arith.divf %257, %258 : vector<16x1xf32>
    %260 = vector.broadcast %252 : vector<16x1xf32> to vector<16x32xf32>
    %261 = arith.subf %248, %260 : vector<16x32xf32>
    %cst_78 = arith.constant 9.99999974E-6 : f32
    %262 = vector.broadcast %cst_78 : f32 to vector<16x1xf32>
    %263 = arith.addf %259, %262 : vector<16x1xf32>
    %264 = math.rsqrt %263 : vector<16x1xf32>
    %265 = vector.broadcast %264 : vector<16x1xf32> to vector<16x32xf32>
    %266 = arith.mulf %261, %265 : vector<16x32xf32>
    %267 = vector.broadcast %154 : vector<1x32xf32> to vector<16x32xf32>
    %268 = arith.mulf %266, %267 : vector<16x32xf32>
    %269 = vector.broadcast %155 : vector<1x32xf32> to vector<16x32xf32>
    %270 = arith.addf %268, %269 : vector<16x32xf32>
    %c0_79 = arith.constant 0 : index
    %c0_80 = arith.constant 0 : index
    %271 = vector.load %arg8[%c0_79, %c0_80] : memref<16x32xf32, #tpu.memory_space<vmem>>, vector<16x32xf32>
    tpu.vector_store %arg8[%c0_79, %c0_80], %270 {strides = array<i32>} : memref<16x32xf32, #tpu.memory_space<vmem>>, vector<16x32xf32>,
    return
  }
}

</mosaic_0001>

<bundles_post_ra>
// kernel: transformer_encoder_block.1
= control target key start
LH: loop header
LB: loop body
LE: loop exit
PB: predicated region body
PF: predicated region fallthrough
CT: control target
= control target key end

     0   :  { %v3255_v0 = vmov 0.0   ;;  %vm3256_vm0 = vmmov 0   ;;  %vm74_vm1 = vcmask 261120   ;;  %s3258_s15 = smov 120   ;;  %s3259_s16 = smov 96   ;;  %vm150_vm2 = vcmask 64512   ;;  %s3898_s1 = inlined_call_operand.vmem [shape: bf16[2,32,96], index: 1, kind: input, shape index: {}]   ;;  %s3899_s0 = inlined_call_operand.vmem [shape: f32[16,32], index: 0, kind: input, shape index: {}]   ;;  %s3900_s2 = inlined_call_operand.vmem [shape: f32[2,1,96], index: 2, kind: input, shape index: {}]   ;;  %s3901_s3 = inlined_call_operand.vmem [shape: bf16[2,32,32], index: 3, kind: input, shape index: {}]   ;;  %s3902_s4 = inlined_call_operand.vmem [shape: f32[2,6,32], index: 4, kind: input, shape index: {}]   ;;  %s3903_s5 = inlined_call_operand.vmem [shape: bf16[2,32,64], index: 5, kind: input, shape index: {}]   ;;  %s3904_s7 = inlined_call_operand.vmem [shape: bf16[2,64,32], index: 7, kind: input, shape index: {}]   ;;  %s3905_s6 = inlined_call_operand.vmem [shape: f32[2,1,64], index: 6, kind: input, shape index: {}]   ;;  %s3906_s8 = inlined_call_operand.vmem [shape: f32[16,32], index: 8, kind: output, shape index: {}]  }
   0x1   :  { %2821 = vmatprep.subr.bf16.mxu1 %v3255_v0  ;;  %v3155_v1 = vld [vmem:[%s3898_s1] sm:$0xff]   ;;  %2825 = vmatprep.mubr.msk.bf16.mxu1 %vm3256_vm0, %v3255_v0  ;;  %v3156_v2 = vld [vmem:[%s3898_s1 + $0x8] sm:$0xff]   ;;  %s3260_s17 = smov 112   ;;  %s3261_s18 = smov 64   ;;  %vm641_vm3 = vcmask 1043456   ;;  %vm1047_vm4 = vcmask 130048  }
   0x2   :  { %2835 = vmatprep.subr.bf16.mxu0 %v3255_v0  ;;  %2837 = vmatprep.mubr.msk.bf16.mxu0 %vm3256_vm0, %v3255_v0  ;;  %v3325_v3 = vld [vmem:[%s3899_s0] sm:$0xff]  ;;  %v3330_v4 = vld [vmem:[%s3899_s0 + $0x8] sm:$0xff]  ;;  %s3257_s0 = smov 104   ;;  %s3262_s19 = smov 8   ;;  %vm1050_vm5 = vcmask 195584   ;;  %vm1249_vm6 = vcmask 523264  }
   0x3   :  { %2822 = vmatpush3.bf16.msra.mxu1 %v3155_v1  ;;  %v55_v5 = vpack.c.bf16 %v3330_v4, %v3325_v3  ;;  %v2642_v6 = vld [vmem:[%s3900_s2] ss:$0 sm:$0xff]  ;;  %s3263_s24 = smov 16   ;;  %s3264_s25 = smov 24  }
   0x4   :  { %2823 = vmatprep.subr.bf16.mxu1 %v3255_v0 }
   0x7   :  { %2824 = vmatpush3.bf16.msra.mxu1 %v3156_v2 }
   0x8   :  { %2829 = vmatprep.subr.bf16.mxu1 %v3255_v0 }
   0xa   :  { %2826 = vmatmul.mubr.msk.bf16.vlgmr.msra.gmra.mrb[0].mxu1 %vm74_vm1, %v55_v5 }
   0xb   :  { %2831 = vmatprep.mubr.msk.bf16.mxu1 %vm3256_vm0, %v3255_v0 }
  0xdd   :  { %v112_v7 = vpop.f32.mrb[0].mxu1 }
  0xde   :  { %v2827_v8 = vpop.f32.mrb[1].mxu1  ;;  %v113_v10 = vadd.f32 %v2642_v6, %v112_v7 }
  0xdf   :  { %v115_v9 = vpop.f32.mrb[2].mxu1 }
  0xe0   :  { %v116_v11 = vadd.f32 %v2642_v6, %v115_v9  ;;  %v2828_v12 = vpop.f32.mrb[3].mxu1  ;;  %v139_v14 = vpack.c.bf16 %v113_v10, %v113_v10 }
  0xe2   :  { %v3105_v13 = vpack.i.bf16 %v116_v11, %v113_v10  ;;  %v140_v15 = vpack.c.bf16 %v116_v11, %v116_v11 }
  0xe4   :  { %3106 = vrot.lane.b32.xlu1 %v3105_v13, %s3257_s0  ;;  %3096 = vrot.lane.b32.xlu0 %v3105_v13, %s3258_s15 }
  0xe8   :  { %148 = vrot.lane.b32.xlu1 %v139_v14, %s3259_s16  ;;  %3101 = vrot.lane.b32.xlu0 %v3105_v13, %s3260_s17 }
  0xec   :  { %198 = vrot.lane.b32.xlu0 %v140_v15, %s3259_s16 }
 0x156   :  { %v3107_v16 = vpop.permute.xlu1 %3106  ;;  %v3097_v17 = vpop.permute.xlu0 %3096 }
 0x157   :  { %v3099_v18 = vunpack.i.h.bf16 %v3097_v17  ;;  %v3098_v19 = vunpack.i.l.bf16 %v3097_v17  ;;  %v3108_v27 = vunpack.i.l.bf16 %v3107_v16  ;;  %v3109_v30 = vunpack.i.h.bf16 %v3107_v16 }
 0x159   :  { %v3347_v20 = vpack.c.bf16 %v3099_v18, %v3099_v18  ;;  %v3349_v21 = vpack.c.bf16 %v3098_v19, %v3098_v19  ;;  %v3366_v33 = vpack.c.bf16 %v3108_v27, %v3108_v27  ;;  %v3369_v34 = vpack.c.bf16 %v3109_v30, %v3109_v30 }
 0x15a   :  { %v149_v22 = vpop.permute.xlu1 %148  ;;  %v3102_v23 = vpop.permute.xlu0 %3101 }
 0x15b   :  { %v155_v24 = vsel %vm150_vm2, %v149_v22, 0  ;;  %v3104_v25 = vunpack.i.h.bf16 %v3102_v23  ;;  %v3103_v26 = vunpack.i.l.bf16 %v3102_v23  ;;  %247 = vrot.lane.b32.xlu1 %v3349_v21, %s3259_s16  ;;  %296 = vrot.lane.b32.xlu0 %v3347_v20, %s3259_s16 }
 0x15c   :  { %2830 = vmatpush3.bf16.xpose.msra.mxu1 %v155_v24 }
 0x15d   :  { %v3356_v28 = vpack.c.bf16 %v3104_v25, %v3104_v25  ;;  %v3358_v29 = vpack.c.bf16 %v3103_v26, %v3103_v26  ;;  %2841 = vmatprep.subr.bf16.mxu1 %v3255_v0 }
 0x15e   :  { %v199_v31 = vpop.permute.xlu0 %198 }
 0x15f   :  { %345 = vrot.lane.b32.xlu1 %v3358_v29, %s3259_s16  ;;  %394 = vrot.lane.b32.xlu0 %v3356_v28, %s3259_s16  ;;  %v204_v32 = vsel %vm150_vm2, %v199_v31, 0 }
 0x160   :  { %2836 = vmatpush3.bf16.xpose.msra.mxu0 %v204_v32 }
 0x161   :  { %2847 = vmatprep.subr.bf16.mxu0 %v3255_v0 }
 0x163   :  { %2832 = vmatmul.mubr.msk.bf16.vlgmr.msra.gmra.mrb[4].mxu1 %vm150_vm2, %v139_v14  ;;  %443 = vrot.lane.b32.xlu1 %v3366_v33, %s3259_s16 }
 0x164   :  { %492 = vrot.lane.b32.xlu0 %v3369_v34, %s3259_s16  ;;  %2843 = vmatprep.mubr.msk.bf16.mxu1 %vm3256_vm0, %v3255_v0 }
 0x167   :  { %685 = vrot.lane.b32.xlu1 %v140_v15, %s3261_s18  ;;  %2838 = vmatmul.mubr.msk.bf16.vlgmr.msra.gmra.mrb[0].mxu0 %vm150_vm2, %v140_v15 }
 0x168   :  { %636 = vrot.lane.b32.xlu0 %v139_v14, %s3261_s18  ;;  %2849 = vmatprep.mubr.msk.bf16.mxu0 %vm3256_vm0, %v3255_v0 }
 0x1cd   :  { %v248_v35 = vpop.permute.xlu1 %247  ;;  %v297_v36 = vpop.permute.xlu0 %296 }
 0x1ce   :  { %v253_v37 = vsel %vm150_vm2, %v248_v35, 0  ;;  %v302_v38 = vsel %vm150_vm2, %v297_v36, 0 }
 0x1cf   :  { %2842 = vmatpush3.bf16.xpose.msra.mxu1 %v253_v37  ;;  %2848 = vmatpush3.bf16.xpose.msra.mxu0 %v302_v38 }
 0x1d0   :  { %2853 = vmatprep.subr.bf16.mxu1 %v3255_v0  ;;  %2859 = vmatprep.subr.bf16.mxu0 %v3255_v0 }
 0x1d1   :  { %v346_v39 = vpop.permute.xlu1 %345  ;;  %v395_v40 = vpop.permute.xlu0 %394 }
 0x1d2   :  { %v351_v41 = vsel %vm150_vm2, %v346_v39, 0  ;;  %v400_v42 = vsel %vm150_vm2, %v395_v40, 0 }
 0x1d5   :  { %v444_v43 = vpop.permute.xlu1 %443 }
 0x1d6   :  { %2844 = vmatmul.mubr.msk.bf16.vlgmr.msra.gmra.mrb[8].mxu1 %vm150_vm2, %v3349_v21  ;;  %2850 = vmatmul.mubr.msk.bf16.vlgmr.msra.gmra.mrb[4].mxu0 %vm150_vm2, %v3347_v20  ;;  %v493_v44 = vpop.permute.xlu0 %492  ;;  %v449_v45 = vsel %vm150_vm2, %v444_v43, 0 }
 0x1d7   :  { %2854 = vmatpush3.bf16.xpose.msra.mxu1 %v351_v41  ;;  %2860 = vmatpush3.bf16.xpose.msra.mxu0 %v400_v42  ;;  %v498_v46 = vsel %vm150_vm2, %v493_v44, 0 }
 0x1d8   :  { %2855 = vmatprep.mubr.msk.bf16.mxu1 %vm3256_vm0, %v3255_v0  ;;  %2861 = vmatprep.mubr.msk.bf16.mxu0 %vm3256_vm0, %v3255_v0 }
 0x1d9   :  { %2865 = vmatprep.subr.bf16.mxu1 %v3255_v0  ;;  %2871 = vmatprep.subr.bf16.mxu0 %v3255_v0  ;;  %v686_v47 = vpop.permute.xlu1 %685 }
 0x1da   :  { %v637_v48 = vpop.permute.xlu0 %636  ;;  %v691_v49 = vsel %vm641_vm3, %v686_v47, 0 }
 0x1db   :  { %v643_v50 = vsel %vm641_vm3, %v637_v48, 0 }
 0x1de   :  { %2856 = vmatmul.mubr.msk.bf16.vlgmr.msra.gmra.mrb[12].mxu1 %vm150_vm2, %v3358_v29  ;;  %2862 = vmatmul.mubr.msk.bf16.vlgmr.msra.gmra.mrb[8].mxu0 %vm150_vm2, %v3356_v28 }
 0x1df   :  { %2866 = vmatpush3.bf16.xpose.msra.mxu1 %v449_v45  ;;  %2872 = vmatpush3.bf16.xpose.msra.mxu0 %v498_v46 }
 0x1e0   :  { %2867 = vmatprep.mubr.msk.bf16.mxu1 %vm3256_vm0, %v3255_v0  ;;  %2873 = vmatprep.mubr.msk.bf16.mxu0 %vm3256_vm0, %v3255_v0 }
 0x1e1   :  { %2877 = vmatprep.subr.bf16.mxu1 %v3255_v0  ;;  %2883 = vmatprep.subr.bf16.mxu0 %v3255_v0 }
 0x1e6   :  { %2868 = vmatmul.mubr.msk.bf16.vlgmr.msra.gmra.mrb[16].mxu1 %vm150_vm2, %v3366_v33  ;;  %2874 = vmatmul.mubr.msk.bf16.vlgmr.msra.gmra.mrb[12].mxu0 %vm150_vm2, %v3369_v34 }
 0x1e7   :  { %2878 = vmatpush3.bf16.msra.mxu1 %v643_v50  ;;  %2884 = vmatpush3.bf16.msra.mxu0 %v691_v49 }
 0x1e8   :  { %2879 = vmatprep.mubr.msk.bf16.mxu1 %vm3256_vm0, %v3255_v0  ;;  %2885 = vmatprep.mubr.msk.bf16.mxu0 %vm3256_vm0, %v3255_v0 }
 0x1e9   :  { %2889 = vmatprep.subr.bf16.mxu1 %v3255_v0  ;;  %2895 = vmatprep.subr.bf16.mxu0 %v3255_v0 }
 0x236   :  { %v191_v51 = vpop.f32.mrb[4].mxu1 }
 0x237   :  { %v2833_v52 = vpop.f32.mrb[5].mxu1  ;;  %v540_v53 = vsel %vm150_vm2, %v191_v51, -inf }
 0x238   :  { %541 = vmax.xlane.f32.xlu1 %v540_v53  ;;  %v194_v54 = vpop.f32.mrb[6].mxu1 }
 0x239   :  { %v2834_v55 = vpop.f32.mrb[7].mxu1 }
 0x23a   :  { %v240_v56 = vpop.f32.mrb[0].mxu0 }
 0x23b   :  { %v2839_v57 = vpop.f32.mrb[1].mxu0  ;;  %v543_v58 = vsel %vm150_vm2, %v240_v56, -inf }
 0x23c   :  { %544 = vmax.xlane.f32.xlu0 %v543_v58  ;;  %v243_v59 = vpop.f32.mrb[2].mxu0 }
 0x23d   :  { %v2840_v60 = vpop.f32.mrb[3].mxu0 }
 0x2a9   :  { %v289_v61 = vpop.f32.mrb[8].mxu1  ;;  %v338_v62 = vpop.f32.mrb[4].mxu0 }
 0x2aa   :  { %v2845_v63 = vpop.f32.mrb[9].mxu1  ;;  %v2851_v1 = vpop.f32.mrb[5].mxu0  ;;  %v549_v2 = vsel %vm150_vm2, %v338_v62, -inf  ;;  %v546_v5 = vsel %vm150_vm2, %v289_v61, -inf }
 0x2ab   :  { %v341_v6 = vpop.f32.mrb[6].mxu0  ;;  %550 = vmax.xlane.f32.xlu1 %v549_v2  ;;  %547 = vmax.xlane.f32.xlu0 %v546_v5  ;;  %v292_v7 = vpop.f32.mrb[10].mxu1 }
 0x2ac   :  { %v2846_v8 = vpop.f32.mrb[11].mxu1  ;;  %v2852_v9 = vpop.f32.mrb[7].mxu0 }
 0x2b1   :  { %v3427_v10 = vpop.f32.mrb[12].mxu1  ;;  %v436_v11 = vpop.f32.mrb[8].mxu0 }
 0x2b2   :  { %v2857_v12 = vpop.f32.mrb[13].mxu1  ;;  %v2863_v13 = vpop.f32.mrb[9].mxu0  ;;  %v555_v14 = vsel %vm150_vm2, %v436_v11, -inf  ;;  %v552_v15 = vsel %vm150_vm2, %v3427_v10, -inf }
 0x2b3   :  { %v439_v16 = vpop.f32.mrb[10].mxu0  ;;  %556 = vmax.xlane.f32.xlu1 %v555_v14  ;;  %553 = vmax.xlane.f32.xlu0 %v552_v15  ;;  %v390_v17 = vpop.f32.mrb[14].mxu1 }
 0x2b4   :  { %v2858_v18 = vpop.f32.mrb[15].mxu1  ;;  %v2864_v19 = vpop.f32.mrb[11].mxu0 }
 0x2b9   :  { %v3432_v22 = vpop.f32.mrb[16].mxu1  ;;  %v534_v23 = vpop.f32.mrb[12].mxu0 }
 0x2ba   :  { %v2869_v24 = vpop.f32.mrb[17].mxu1  ;;  %v2875_v25 = vpop.f32.mrb[13].mxu0  ;;  %v561_v26 = vsel %vm150_vm2, %v534_v23, -inf  ;;  %v558_v27 = vsel %vm150_vm2, %v3432_v22, -inf }
 0x2bb   :  { %v537_v30 = vpop.f32.mrb[14].mxu0  ;;  %562 = vmax.xlane.f32.xlu1 %v561_v26  ;;  %559 = vmax.xlane.f32.xlu0 %v558_v27  ;;  %v488_v31 = vpop.f32.mrb[18].mxu1 }
 0x2bc   :  { %v2870_v32 = vpop.f32.mrb[19].mxu1  ;;  %v2876_v35 = vpop.f32.mrb[15].mxu0 }
 0x2c5   :  { %v542_v36 = vpop.xlane.xlu1 %541 }
 0x2c6   :  { %v564_v38 = vsub.f32 %v191_v51, %v542_v36 }
 0x2c8   :  { %v572_v40 = vmul.f32 1.442695, %v564_v38 }
 0x2c9   :  { %v545_v37 = vpop.xlane.xlu0 %544 }
 0x2ca   :  { %v565_v39 = vsub.f32 %v240_v56, %v545_v37  ;;  %3175 = vpow2.f32 %v572_v40 }
 0x2cc   :  { %733 = vrot.lane.b32.xlu1 %v3349_v21, %s3261_s18  ;;  %v574_v41 = vmul.f32 1.442695, %v565_v39 }
 0x2ce   :  { %3177 = vpow2.f32 %v574_v41 }
 0x2d1   :  { %781 = vrot.lane.b32.xlu0 %v3347_v20, %s3261_s18 }
 0x2d4   :  { %v3176_v42 = vpop.eup %3175 }
 0x2d5   :  { %v588_v45 = vsel %vm150_vm2, %v3176_v42, 0.0 }
 0x2d8   :  { %v3178_v43 = vpop.eup %3177 }
 0x2d9   :  { %v591_v44 = vsel %vm150_vm2, %v3178_v43, 0.0 }
 0x2f0   :  { %592 = vadd.xlane.f32.xlu1 %v591_v44  ;;  %589 = vadd.xlane.f32.xlu0 %v588_v45 }
 0x301   :  { %829 = vrot.lane.b32.xlu1 %v3358_v29, %s3261_s18 }
 0x338   :  { %v551_v20 = vpop.xlane.xlu1 %550  ;;  %v548_v21 = vpop.xlane.xlu0 %547 }
 0x339   :  { %v567_v46 = vsub.f32 %v338_v62, %v551_v20  ;;  %v566_v47 = vsub.f32 %v289_v61, %v548_v21 }
 0x33b   :  { %v578_v48 = vmul.f32 1.442695, %v567_v46  ;;  %v576_v49 = vmul.f32 1.442695, %v566_v47 }
 0x33d   :  { %3179 = vpow2.f32 %v578_v48 }
 0x33e   :  { %3181 = vpow2.f32 %v576_v49 }
 0x340   :  { %v557_v50 = vpop.xlane.xlu1 %556  ;;  %v554_v63 = vpop.xlane.xlu0 %553 }
 0x341   :  { %v569_v51 = vsub.f32 %v436_v11, %v557_v50  ;;  %v568_v1 = vsub.f32 %v3427_v10, %v554_v63 }
 0x343   :  { %v582_v52 = vmul.f32 1.442695, %v569_v51  ;;  %v580_v5 = vmul.f32 1.442695, %v568_v1 }
 0x345   :  { %3183 = vpow2.f32 %v582_v52 }
 0x347   :  { %v3445_v53 = vpop.eup %3179 }
 0x348   :  { %v3447_v54 = vpop.eup %3181  ;;  %v563_v55 = vpop.xlane.xlu1 %562  ;;  %v597_v29 = vsel %vm150_vm2, %v3445_v53, 0.0 }
 0x349   :  { %v571_v56 = vsub.f32 %v534_v23, %v563_v55  ;;  %598 = vadd.xlane.f32.xlu1 %v597_v29  ;;  %v594_v57 = vsel %vm150_vm2, %v3447_v54, 0.0  ;;  %v560_v2 = vpop.xlane.xlu0 %559 }
 0x34a   :  { %595 = vadd.xlane.f32.xlu0 %v594_v57  ;;  %v570_v6 = vsub.f32 %v3432_v22, %v560_v2 }
 0x34b   :  { %v586_v58 = vmul.f32 1.442695, %v571_v56 }
 0x34c   :  { %v584_v7 = vmul.f32 1.442695, %v570_v6  ;;  %v734_v8 = vpop.permute.xlu1 %733 }
 0x34d   :  { %3185 = vpow2.f32 %v586_v58  ;;  %v782_v9 = vpop.permute.xlu0 %781  ;;  %v739_v23 = vsel %vm641_vm3, %v734_v8, 0 }
 0x34e   :  { %3187 = vpow2.f32 %v580_v5  ;;  %v787_v22 = vsel %vm641_vm3, %v782_v9, 0 }
 0x34f   :  { %v3453_v59 = vpop.eup %3183  ;;  %3189 = vpow2.f32 %v584_v7 }
 0x350   :  { %v603_v60 = vsel %vm150_vm2, %v3453_v59, 0.0 }
 0x351   :  { %604 = vadd.xlane.f32.xlu1 %v603_v60 }
 0x357   :  { %v3457_v61 = vpop.eup %3185 }
 0x358   :  { %v609_v62 = vsel %vm150_vm2, %v3457_v61, 0.0  ;;  %v3467_v11 = vpop.eup %3187 }
 0x359   :  { %610 = vadd.xlane.f32.xlu1 %v609_v62  ;;  %v3471_v10 = vpop.eup %3189 }
 0x360   :  { %877 = vrot.lane.b32.xlu0 %v3356_v28, %s3261_s18  ;;  %v600_v28 = vsel %vm150_vm2, %v3467_v11, 0.0 }
 0x36a   :  { %925 = vrot.lane.b32.xlu1 %v3366_v33, %s3261_s18  ;;  %v606_v33 = vsel %vm150_vm2, %v3471_v10, 0.0 }
 0x37d   :  { %v593_v12 = vpop.xlane.xlu1 %592  ;;  %v590_v13 = vpop.xlane.xlu0 %589 }
 0x37e   :  { %3191 = vrcp.f32 %v593_v12 }
 0x37f   :  { %3193 = vrcp.f32 %v590_v13  ;;  %601 = vadd.xlane.f32.xlu0 %v600_v28 }
 0x381   :  { %v830_v24 = vpop.permute.xlu1 %829 }
 0x383   :  { %607 = vadd.xlane.f32.xlu0 %v606_v33 }
 0x388   :  { %v3192_v14 = vpop.eup %3191 }
 0x389   :  { %v3194_v15 = vpop.eup %3193  ;;  %v615_v16 = vmul.f32 %v3192_v14, %v3178_v43  ;;  %v3157_v14 = vld [vmem:[%s3901_s3] sm:$0xff]  }
 0x38a   :  { %v613_v17 = vmul.f32 %v3194_v15, %v3176_v42 }
 0x38b   :  { %v629_v18 = vpack.c.bf16 %v615_v16, %v615_v16 }
 0x38c   :  { %v628_v19 = vpack.c.bf16 %v613_v17, %v613_v17 }
 0x38d   :  { %2886 = vmatmul.mubr.msk.bf16.vlgmr.msra.gmra.mrb[16].mxu0 %vm150_vm2, %v629_v18  ;;  %v3158_v18 = vld [vmem:[%s3901_s3 + $0x8] sm:$0xff]  }
 0x38e   :  { %2880 = vmatmul.mubr.msk.bf16.vlgmr.msra.gmra.mrb[20].mxu1 %vm150_vm2, %v628_v19  ;;  %2896 = vmatpush3.bf16.msra.mxu0 %v787_v22 }
 0x38f   :  { %2890 = vmatpush3.bf16.msra.mxu1 %v739_v23  ;;  %2891 = vmatprep.mubr.msk.bf16.mxu1 %vm3256_vm0, %v3255_v0 }
 0x390   :  { %2897 = vmatprep.mubr.msk.bf16.mxu0 %vm3256_vm0, %v3255_v0  ;;  %2901 = vmatprep.subr.bf16.mxu1 %v3255_v0 }
 0x391   :  { %2907 = vmatprep.subr.bf16.mxu0 %v3255_v0 }
 0x399   :  { %973 = vrot.lane.b32.xlu0 %v3369_v34, %s3261_s18  ;;  %v835_v34 = vsel %vm641_vm3, %v830_v24, 0 }
 0x3d6   :  { %v599_v25 = vpop.xlane.xlu1 %598 }
 0x3d7   :  { %3195 = vrcp.f32 %v599_v25  ;;  %v596_v26 = vpop.xlane.xlu0 %595 }
 0x3d8   :  { %3197 = vrcp.f32 %v596_v26 }
 0x3db   :  { %v878_v36 = vpop.permute.xlu0 %877 }
 0x3dc   :  { %v883_v39 = vsel %vm641_vm3, %v878_v36, 0 }
 0x3de   :  { %v605_v27 = vpop.xlane.xlu1 %604 }
 0x3df   :  { %3199 = vrcp.f32 %v605_v27 }
 0x3e1   :  { %v3196_v30 = vpop.eup %3195 }
 0x3e2   :  { %v3198_v31 = vpop.eup %3197  ;;  %v619_v32 = vmul.f32 %v3196_v30, %v3445_v53 }
 0x3e3   :  { %v617_v35 = vmul.f32 %v3198_v31, %v3447_v54 }
 0x3e4   :  { %v631_v37 = vpack.c.bf16 %v619_v32, %v619_v32 }
 0x3e5   :  { %v630_v38 = vpack.c.bf16 %v617_v35, %v617_v35 }
 0x3e6   :  { %2898 = vmatmul.mubr.msk.bf16.vlgmr.msra.gmra.mrb[20].mxu0 %vm150_vm2, %v631_v37  ;;  %v611_v43 = vpop.xlane.xlu1 %610 }
 0x3e7   :  { %2892 = vmatmul.mubr.msk.bf16.vlgmr.msra.gmra.mrb[24].mxu1 %vm150_vm2, %v630_v38  ;;  %2908 = vmatpush3.bf16.msra.mxu0 %v883_v39  ;;  %3201 = vrcp.f32 %v611_v43 }
 0x3e8   :  { %2902 = vmatpush3.bf16.msra.mxu1 %v835_v34  ;;  %2909 = vmatprep.mubr.msk.bf16.mxu0 %vm3256_vm0, %v3255_v0 }
 0x3e9   :  { %v3200_v40 = vpop.eup %3199  ;;  %2919 = vmatprep.subr.bf16.mxu0 %v3255_v0  ;;  %2903 = vmatprep.mubr.msk.bf16.mxu1 %vm3256_vm0, %v3255_v0 }
 0x3ea   :  { %v623_v41 = vmul.f32 %v3200_v40, %v3453_v59  ;;  %2913 = vmatprep.subr.bf16.mxu1 %v3255_v0  ;;  %v926_v51 = vpop.permute.xlu1 %925 }
 0x3eb   :  { %v931_v54 = vsel %vm641_vm3, %v926_v51, 0 }
 0x3ec   :  { %v633_v42 = vpack.c.bf16 %v623_v41, %v623_v41 }
 0x3ee   :  { %2910 = vmatmul.mubr.msk.bf16.vlgmr.msra.gmra.mrb[24].mxu0 %vm150_vm2, %v633_v42 }
 0x3ef   :  { %2921 = vmatprep.mubr.msk.bf16.mxu0 %vm3256_vm0, %v3255_v0 }
 0x3f1   :  { %v3202_v45 = vpop.eup %3201 }
 0x3f2   :  { %v627_v21 = vmul.f32 %v3202_v45, %v3457_v61 }
 0x3f4   :  { %v635_v49 = vpack.c.bf16 %v627_v21, %v627_v21 }
 0x40c   :  { %v602_v44 = vpop.xlane.xlu0 %601 }
 0x40d   :  { %3203 = vrcp.f32 %v602_v44 }
 0x410   :  { %v608_v20 = vpop.xlane.xlu0 %607 }
 0x411   :  { %3205 = vrcp.f32 %v608_v20 }
 0x414   :  { %v974_v46 = vpop.permute.xlu0 %973 }
 0x415   :  { %v979_v47 = vsel %vm641_vm3, %v974_v46, 0 }
 0x416   :  { %2920 = vmatpush3.bf16.msra.mxu0 %v979_v47 }
 0x417   :  { %v3204_v48 = vpop.eup %3203  ;;  %2933 = vmatprep.subr.bf16.mxu0 %v3255_v0 }
 0x418   :  { %v621_v50 = vmul.f32 %v3204_v48, %v3467_v11 }
 0x419   :  { %2922 = vmatmul.mubr.msk.bf16.vlgmr.msra.gmra.mrb[28].mxu0 %vm150_vm2, %v635_v49  ;;  %v1054_v49 = vlaneseq }
 0x41a   :  { %v632_v52 = vpack.c.bf16 %v621_v50, %v621_v50  ;;  %2937 = vmatprep.mubr.msk.bf16.mxu0 %vm3256_vm0, %v3255_v0 }
 0x41b   :  { %v3206_v53 = vpop.eup %3205  ;;  %v3539_v50 = vshrl.u32 %v1054_v49, 7 }
 0x41c   :  { %2904 = vmatmul.mubr.msk.bf16.vlgmr.msra.gmra.mrb[28].mxu1 %vm150_vm2, %v632_v52  ;;  %v625_v55 = vmul.f32 %v3206_v53, %v3471_v10  ;;  %v3545_v52 = vld [vmem:[%s3902_s4] sm:$0x3f] }
 0x41d   :  { %2914 = vmatpush3.bf16.msra.mxu1 %v931_v54  ;;  %2915 = vmatprep.mubr.msk.bf16.mxu1 %vm3256_vm0, %v3255_v0  ;;  %v1056_v51 = vsub.s32 0, %v3539_v50 }
 0x41e   :  { %2925 = vmatprep.subr.bf16.mxu1 %v3255_v0  ;;  %v634_v29 = vpack.c.bf16 %v625_v55, %v625_v55 }
 0x41f   :  { %v1057_v53 = vrot.slane %v3545_v52, %v1056_v51 }
 0x424   :  { %2916 = vmatmul.mubr.msk.bf16.vlgmr.msra.gmra.mrb[32].mxu1 %vm150_vm2, %v634_v29 }
 0x425   :  { %2929 = vmatprep.mubr.msk.bf16.mxu1 %vm3256_vm0, %v3255_v0  ;;  %2926 = vmatpush3.bf16.msra.mxu1 %v3157_v14 }
 0x426   :  { %2927 = vmatprep.subr.bf16.mxu1 %v3255_v0 }
 0x429   :  { %2928 = vmatpush3.bf16.msra.mxu1 %v3158_v18  ;;  %v1145_v18 = vsub.s32 1, %v3539_v50 }
 0x42a   :  { %2941 = vmatprep.subr.bf16.mxu1 %v3255_v0 }
 0x460   :  { %v727_v56 = vpop.f32.mrb[16].mxu0 }
 0x461   :  { %v679_v57 = vpop.f32.mrb[20].mxu1  ;;  %v2887_v58 = vpop.f32.mrb[17].mxu0 }
 0x462   :  { %v2881_v59 = vpop.f32.mrb[21].mxu1  ;;  %v730_v60 = vpop.f32.mrb[18].mxu0 }
 0x463   :  { %v682_v61 = vpop.f32.mrb[22].mxu1  ;;  %v2888_v62 = vpop.f32.mrb[19].mxu0 }
 0x464   :  { %v2882_v63 = vpop.f32.mrb[23].mxu1 }
 0x4b9   :  { %v823_v1 = vpop.f32.mrb[20].mxu0 }
 0x4ba   :  { %v775_v2 = vpop.f32.mrb[24].mxu1  ;;  %v2899_v5 = vpop.f32.mrb[21].mxu0 }
 0x4bb   :  { %v3110_v6 = vpack.i.bf16 %v823_v1, %v775_v2  ;;  %v2893_v7 = vpop.f32.mrb[25].mxu1  ;;  %v826_v8 = vpop.f32.mrb[22].mxu0 }
 0x4bc   :  { %v778_v9 = vpop.f32.mrb[26].mxu1  ;;  %v2900_v11 = vpop.f32.mrb[23].mxu0 }
 0x4bd   :  { %3111 = vrot.lane.b32.xlu1 %v3110_v6, %s3262_s19  ;;  %v2894_v12 = vpop.f32.mrb[27].mxu1 }
 0x4be   :  { %v3160_v12 = vld [vmem:[%s3903_s5 + $0x8] sm:$0xff]  }
 0x4c1   :  { %v919_v13 = vpop.f32.mrb[24].mxu0 }
 0x4c2   :  { %v2911_v28 = vpop.f32.mrb[25].mxu0 }
 0x4c3   :  { %v922_v10 = vpop.f32.mrb[26].mxu0  ;;  %v3162_v28 = vld [vmem:[%s3904_s7 + $0x8] sm:$0xff]  }
 0x4c4   :  { %v2912_v33 = vpop.f32.mrb[27].mxu0 }
 0x4ec   :  { %v1015_v15 = vpop.f32.mrb[28].mxu0 }
 0x4ed   :  { %v2923_v16 = vpop.f32.mrb[29].mxu0 }
 0x4ee   :  { %v1018_v17 = vpop.f32.mrb[30].mxu0 }
 0x4ef   :  { %v871_v19 = vpop.f32.mrb[28].mxu1  ;;  %v2924_v22 = vpop.f32.mrb[31].mxu0 }
 0x4f0   :  { %v3115_v23 = vpack.i.bf16 %v919_v13, %v871_v19  ;;  %v2905_v24 = vpop.f32.mrb[29].mxu1  ;;  %v3161_v13 = vld [vmem:[%s3904_s7] sm:$0xff]   ;;  %v1146_v22 = vrot.slane %v3545_v52, %v1145_v18 }
 0x4f1   :  { %v874_v25 = vpop.f32.mrb[30].mxu1  ;;  %v1151_v24 = vsub.s32 2, %v3539_v50 }
 0x4f2   :  { %3116 = vrot.lane.b32.xlu0 %v3115_v23, %s3263_s24  ;;  %v2906_v26 = vpop.f32.mrb[31].mxu1 }
 0x4f7   :  { %v967_v27 = vpop.f32.mrb[32].mxu1 }
 0x4f8   :  { %v3120_v30 = vpack.i.bf16 %v1015_v15, %v967_v27  ;;  %v2917_v31 = vpop.f32.mrb[33].mxu1 }
 0x4f9   :  { %v970_v32 = vpop.f32.mrb[34].mxu1 }
 0x4fa   :  { %3121 = vrot.lane.b32.xlu1 %v3120_v30, %s3264_s25  ;;  %v2918_v35 = vpop.f32.mrb[35].mxu1  ;;  %v1152_v30 = vrot.slane %v3545_v52, %v1151_v24 }
 0x52f   :  { %v3112_v36 = vpop.permute.xlu1 %3111 }
 0x530   :  { %v3114_v38 = vunpack.i.h.bf16 %v3112_v36  ;;  %v3113_v39 = vunpack.i.l.bf16 %v3112_v36 }
 0x532   :  { %v1046_v42 = vsel %vm150_vm2, %v727_v56, %v3114_v38  ;;  %v1045_v43 = vsel %vm150_vm2, %v679_v57, %v3113_v39  ;;  %v3164_v38 = vld [vmem:[%s3904_s7 + $0x18] sm:$0xff]   ;;  %v2665_v39 = vld [vmem:[%s3905_s6] ss:$0 sm:$0xff] }
 0x564   :  { %v3117_v37 = vpop.permute.xlu0 %3116 }
 0x565   :  { %v3119_v34 = vunpack.i.h.bf16 %v3117_v37  ;;  %v3118_v40 = vunpack.i.l.bf16 %v3117_v37  ;;  %v3163_v37 = vld [vmem:[%s3904_s7 + $0x10] sm:$0xff]  }
 0x567   :  { %v1049_v20 = vsel %vm1047_vm4, %v1046_v42, %v3119_v34  ;;  %v1048_v21 = vsel %vm1047_vm4, %v1045_v43, %v3118_v40 }
 0x56c   :  { %v3122_v41 = vpop.permute.xlu1 %3121 }
 0x56d   :  { %v3124_v44 = vunpack.i.h.bf16 %v3122_v41  ;;  %v3123_v45 = vunpack.i.l.bf16 %v3122_v41 }
 0x56f   :  { %v1052_v46 = vsel %vm1050_vm5, %v1049_v20, %v3124_v44  ;;  %v1051_v47 = vsel %vm1050_vm5, %v1048_v21, %v3123_v45 }
 0x570   :  { %v1053_v48 = vpack.c.bf16 %v1052_v46, %v1051_v47  ;;  %v1223_v46 = vsub.s32 3, %v3539_v50 }
 0x572   :  { %2930 = vmatmul.mubr.msk.bf16.vlgmr.msra.gmra.mrb[36].mxu1 %vm74_vm1, %v1053_v48  ;;  %v1224_v47 = vrot.slane %v3545_v52, %v1223_v46 }
 0x573   :  { %2949 = vmatprep.mubr.msk.bf16.mxu1 %vm3256_vm0, %v3255_v0  ;;  %2942 = vmatpush3.bf16.msra.mxu1 %v3161_v13 }
 0x574   :  { %2943 = vmatprep.subr.bf16.mxu1 %v3255_v0 }
 0x577   :  { %2944 = vmatpush3.bf16.msra.mxu1 %v3162_v28 }
 0x578   :  { %2945 = vmatprep.subr.bf16.mxu1 %v3255_v0 }
 0x57b   :  { %2946 = vmatpush3.bf16.msra.mxu1 %v3163_v37 }
 0x57c   :  { %2947 = vmatprep.subr.bf16.mxu1 %v3255_v0 }
 0x57f   :  { %2948 = vmatpush3.bf16.msra.mxu1 %v3164_v38 }
 0x580   :  { %2967 = vmatprep.subr.bf16.mxu1 %v3255_v0 }
 0x645   :  { %v1107_v54 = vpop.f32.mrb[36].mxu1 }
 0x646   :  { %v1108_v55 = vadd.f32 %v1107_v54, %v1057_v53  ;;  %v2931_v29 = vpop.f32.mrb[37].mxu1 }
 0x647   :  { %v1110_v56 = vpop.f32.mrb[38].mxu1 }
 0x648   :  { %v1111_v57 = vadd.f32 %v1110_v56, %v1057_v53  ;;  %v2932_v58 = vpop.f32.mrb[39].mxu1  ;;  %v1114_v59 = vadd.f32 %v1108_v55, %v3325_v3 }
 0x64a   :  { %v1116_v60 = vsel %vm74_vm1, %v1114_v59, 0.0  ;;  %v1115_v61 = vadd.f32 %v1111_v57, %v3330_v4  ;;  %v3159_v4 = vld [vmem:[%s3903_s5] sm:$0xff]  }
 0x64b   :  { %1117 = vadd.xlane.f32.xlu0 %v1116_v60  ;;  %2934 = vmatpush3.bf16.msra.mxu0 %v3159_v4 }
 0x64c   :  { %v1119_v62 = vsel %vm74_vm1, %v1115_v61, 0.0  ;;  %2935 = vmatprep.subr.bf16.mxu0 %v3255_v0 }
 0x64d   :  { %1120 = vadd.xlane.f32.xlu1 %v1119_v62 }
 0x64f   :  { %2936 = vmatpush3.bf16.msra.mxu0 %v3160_v12 }
 0x650   :  { %2953 = vmatprep.subr.bf16.mxu0 %v3255_v0 }
 0x6d8   :  { %v1118_v63 = vpop.xlane.xlu0 %1117 }
 0x6d9   :  { %v1123_v1 = vmul.f32 0.03125, %v1118_v63 }
 0x6da   :  { %v1121_v2 = vpop.xlane.xlu1 %1120 }
 0x6db   :  { %v1125_v5 = vsub.f32 %v1114_v59, %v1123_v1  ;;  %v1124_v6 = vmul.f32 0.03125, %v1121_v2 }
 0x6dd   :  { %v1126_v7 = vsub.f32 %v1115_v61, %v1124_v6  ;;  %v1127_v8 = vmul.f32 %v1125_v5, %v1125_v5 }
 0x6df   :  { %v1129_v9 = vsel %vm74_vm1, %v1127_v8, 0.0  ;;  %v1128_v11 = vmul.f32 %v1126_v7, %v1126_v7 }
 0x6e0   :  { %1130 = vadd.xlane.f32.xlu0 %v1129_v9  ;;  %v3165_v9 = vld [vmem:[%s3898_s1 + $0x10] sm:$0xff]  }
 0x6e1   :  { %v1132_v3 = vsel %vm74_vm1, %v1128_v11, 0.0  ;;  %v3166_v11 = vld [vmem:[%s3898_s1 + $0x18] sm:$0xff]  }
 0x6e4   :  { %1133 = vadd.xlane.f32.xlu0 %v1132_v3 }
 0x76d   :  { %v1131_v10 = vpop.xlane.xlu0 %1130 }
 0x76e   :  { %v1135_v33 = vmul.f32 0.03125, %v1131_v10 }
 0x770   :  { %v1137_v14 = vadd.f32 1e-05, %v1135_v33  ;;  %v1324_v33 = vsub.s32 4, %v3539_v50 }
 0x771   :  { %v1134_v15 = vpop.xlane.xlu0 %1133 }
 0x772   :  { %3207 = vrsqrt.f32 %v1137_v14  ;;  %v1136_v16 = vmul.f32 0.03125, %v1134_v15  ;;  %v1325_v14 = vrot.slane %v3545_v52, %v1324_v33  ;;  %v1330_v15 = vsub.s32 5, %v3539_v50 }
 0x774   :  { %v1138_v17 = vadd.f32 1e-05, %v1136_v16 }
 0x776   :  { %3209 = vrsqrt.f32 %v1138_v17 }
 0x77c   :  { %v3208_v19 = vpop.eup %3207 }
 0x77d   :  { %v1141_v23 = vmul.f32 %v3208_v19, %v1125_v5 }
 0x77f   :  { %v1147_v26 = vmul.f32 %v1146_v22, %v1141_v23 }
 0x780   :  { %v3210_v25 = vpop.eup %3209 }
 0x781   :  { %v1142_v27 = vmul.f32 %v3210_v25, %v1126_v7  ;;  %v1153_v32 = vadd.f32 %v1152_v30, %v1147_v26  ;;  %v1331_v25 = vrot.slane %v3545_v52, %v1330_v15 }
 0x783   :  { %v1148_v31 = vmul.f32 %v1146_v22, %v1142_v27 }
 0x785   :  { %v1154_v35 = vadd.f32 %v1152_v30, %v1148_v31 }
 0x787   :  { %v1155_v36 = vpack.c.bf16 %v1154_v35, %v1153_v32 }
 0x789   :  { %2938 = vmatmul.mubr.msk.bf16.vlgmr.msra.gmra.mrb[32].mxu0 %vm74_vm1, %v1155_v36 }
 0x78a   :  { %2957 = vmatprep.mubr.msk.bf16.mxu0 %vm3256_vm0, %v3255_v0  ;;  %2954 = vmatpush3.bf16.msra.mxu0 %v3165_v9 }
 0x78b   :  { %2955 = vmatprep.subr.bf16.mxu0 %v3255_v0 }
 0x78e   :  { %2956 = vmatpush3.bf16.msra.mxu0 %v3166_v11 }
 0x78f   :  { %2961 = vmatprep.subr.bf16.mxu0 %v3255_v0 }
 0x85c   :  { %v1211_v34 = vpop.f32.mrb[32].mxu0 }
 0x85d   :  { %v1212_v40 = vadd.f32 %v2665_v39, %v1211_v34  ;;  %v2939_v41 = vpop.f32.mrb[33].mxu0 }
 0x85e   :  { %v1214_v42 = vpop.f32.mrb[34].mxu0 }
 0x85f   :  { %v1215_v43 = vadd.f32 %v2665_v39, %v1214_v42  ;;  %v2940_v44 = vpop.f32.mrb[35].mxu0  ;;  %v1218_v45 = vmax.f32 %v1212_v40, 0.0 }
 0x861   :  { %v1219_v20 = vmax.f32 %v1215_v43, 0.0 }
 0x863   :  { %v1220_v21 = vpack.c.bf16 %v1219_v20, %v1218_v45 }
 0x865   :  { %2950 = vmatmul.mubr.msk.bf16.vlgmr.msra.gmra.mrb[40].mxu1 %vm1249_vm6, %v1220_v21 }
 0x866   :  { %2969 = vmatprep.mubr.msk.bf16.mxu1 %vm3256_vm0, %v3255_v0 }
 0x938   :  { %v1287_v48 = vpop.f32.mrb[40].mxu1 }
 0x939   :  { %v1288_v49 = vadd.f32 %v1287_v48, %v1224_v47  ;;  %v2951_v53 = vpop.f32.mrb[41].mxu1 }
 0x93a   :  { %v1290_v54 = vpop.f32.mrb[42].mxu1 }
 0x93b   :  { %v1291_v55 = vadd.f32 %v1290_v54, %v1224_v47  ;;  %v2952_v29 = vpop.f32.mrb[43].mxu1  ;;  %v1294_v56 = vadd.f32 %v1288_v49, %v1153_v32  ;;  %v2697_v32 = vld [vmem:[%s3900_s2 + $0x1] ss:$0 sm:$0xff] }
 0x93d   :  { %v1296_v57 = vsel %vm74_vm1, %v1294_v56, 0.0  ;;  %v1295_v58 = vadd.f32 %v1291_v55, %v1154_v35 }
 0x93e   :  { %1297 = vadd.xlane.f32.xlu1 %v1296_v57 }
 0x93f   :  { %v1299_v59 = vsel %vm74_vm1, %v1295_v58, 0.0 }
 0x940   :  { %1300 = vadd.xlane.f32.xlu0 %v1299_v59 }
 0x9cb   :  { %v1298_v60 = vpop.xlane.xlu1 %1297 }
 0x9cc   :  { %v1302_v61 = vmul.f32 0.03125, %v1298_v60 }
 0x9cd   :  { %v1301_v62 = vpop.xlane.xlu0 %1300 }
 0x9ce   :  { %v1304_v63 = vsub.f32 %v1294_v56, %v1302_v61  ;;  %v1303_v1 = vmul.f32 0.03125, %v1301_v62 }
 0x9d0   :  { %v1305_v2 = vsub.f32 %v1295_v58, %v1303_v1  ;;  %v1306_v5 = vmul.f32 %v1304_v63, %v1304_v63 }
 0x9d2   :  { %v1308_v6 = vsel %vm74_vm1, %v1306_v5, 0.0  ;;  %v1307_v7 = vmul.f32 %v1305_v2, %v1305_v2 }
 0x9d3   :  { %1309 = vadd.xlane.f32.xlu1 %v1308_v6 }
 0x9d4   :  { %v1311_v8 = vsel %vm74_vm1, %v1307_v7, 0.0 }
 0x9d5   :  { %1312 = vadd.xlane.f32.xlu0 %v1311_v8 }
 0xa60   :  { %v1310_v3 = vpop.xlane.xlu1 %1309 }
 0xa61   :  { %v1314_v4 = vmul.f32 0.03125, %v1310_v3 }
 0xa62   :  { %v1313_v12 = vpop.xlane.xlu0 %1312 }
 0xa63   :  { %v1316_v13 = vadd.f32 1e-05, %v1314_v4  ;;  %v1315_v28 = vmul.f32 0.03125, %v1313_v12 }
 0xa65   :  { %3211 = vrsqrt.f32 %v1316_v13  ;;  %v1317_v10 = vadd.f32 1e-05, %v1315_v28 }
 0xa67   :  { %3213 = vrsqrt.f32 %v1317_v10 }
 0xa6f   :  { %v3212_v16 = vpop.eup %3211 }
 0xa70   :  { %v1320_v17 = vmul.f32 %v3212_v16, %v1304_v63 }
 0xa71   :  { %v3214_v19 = vpop.eup %3213 }
 0xa72   :  { %v1326_v22 = vmul.f32 %v1325_v14, %v1320_v17  ;;  %v1321_v23 = vmul.f32 %v3214_v19, %v1305_v2 }
 0xa74   :  { %v1327_v26 = vmul.f32 %v1325_v14, %v1321_v23  ;;  %v3621_v27 = vadd.f32 %v1331_v25, %v1326_v22 }
 0xa76   :  { %v3623_v30 = vadd.f32 %v1331_v25, %v1327_v26 }
 0xa78   :  { %v1364_v31 = vpack.c.bf16 %v3623_v30, %v3621_v27 }
 0xa7a   :  { %2958 = vmatmul.mubr.msk.bf16.vlgmr.msra.gmra.mrb[36].mxu0 %vm74_vm1, %v1364_v31 }
 0xa7b   :  { %2963 = vmatprep.mubr.msk.bf16.mxu0 %vm3256_vm0, %v3255_v0 }
 0xb4d   :  { %v1420_v35 = vpop.f32.mrb[36].mxu0 }
 0xb4e   :  { %v2959_v36 = vpop.f32.mrb[37].mxu0  ;;  %v1421_v37 = vadd.f32 %v2697_v32, %v1420_v35 }
 0xb4f   :  { %v1423_v52 = vpop.f32.mrb[38].mxu0 }
 0xb50   :  { %v1424_v38 = vadd.f32 %v2697_v32, %v1423_v52  ;;  %v2960_v39 = vpop.f32.mrb[39].mxu0  ;;  %v1447_v41 = vpack.c.bf16 %v1421_v37, %v1421_v37 }
 0xb52   :  { %v3130_v34 = vpack.i.bf16 %v1424_v38, %v1421_v37  ;;  %v1448_v40 = vpack.c.bf16 %v1424_v38, %v1424_v38 }
 0xb54   :  { %3131 = vrot.lane.b32.xlu0 %v3130_v34, %s3260_s17  ;;  %3126 = vrot.lane.b32.xlu1 %v3130_v34, %s3258_s15 }
 0xb58   :  { %3136 = vrot.lane.b32.xlu1 %v3130_v34, %s3257_s0  ;;  %1505 = vrot.lane.b32.xlu0 %v1448_v40, %s3259_s16 }
 0xb5c   :  { %1456 = vrot.lane.b32.xlu1 %v1447_v41, %s3259_s16 }
 0xbc6   :  { %v3132_v42 = vpop.permute.xlu0 %3131  ;;  %v3127_v43 = vpop.permute.xlu1 %3126 }
 0xbc7   :  { %v3129_v44 = vunpack.i.h.bf16 %v3127_v43  ;;  %v3128_v45 = vunpack.i.l.bf16 %v3127_v43  ;;  %v3134_v20 = vunpack.i.h.bf16 %v3132_v42  ;;  %v3133_v21 = vunpack.i.l.bf16 %v3132_v42 }
 0xbc9   :  { %v3638_v47 = vpack.c.bf16 %v3129_v44, %v3129_v44  ;;  %v3640_v48 = vpack.c.bf16 %v3128_v45, %v3128_v45  ;;  %v3647_v55 = vpack.c.bf16 %v3134_v20, %v3134_v20  ;;  %v3649_v29 = vpack.c.bf16 %v3133_v21, %v3133_v21 }
 0xbca   :  { %v3137_v49 = vpop.permute.xlu1 %3136  ;;  %v1506_v53 = vpop.permute.xlu0 %1505 }
 0xbcb   :  { %v1511_v54 = vsel %vm150_vm2, %v1506_v53, 0  ;;  %1554 = vrot.lane.b32.xlu1 %v3640_v48, %s3259_s16  ;;  %1603 = vrot.lane.b32.xlu0 %v3638_v47, %s3259_s16  ;;  %v3139_v56 = vunpack.i.h.bf16 %v3137_v49  ;;  %v3138_v57 = vunpack.i.l.bf16 %v3137_v49 }
 0xbcc   :  { %2968 = vmatpush3.bf16.xpose.msra.mxu1 %v1511_v54 }
 0xbcd   :  { %2979 = vmatprep.subr.bf16.mxu1 %v3255_v0  ;;  %v3657_v60 = vpack.c.bf16 %v3139_v56, %v3139_v56  ;;  %v3659_v61 = vpack.c.bf16 %v3138_v57, %v3138_v57 }
 0xbce   :  { %v1457_v58 = vpop.permute.xlu1 %1456 }
 0xbcf   :  { %v1462_v59 = vsel %vm150_vm2, %v1457_v58, 0  ;;  %1652 = vrot.lane.b32.xlu1 %v3649_v29, %s3259_s16  ;;  %1701 = vrot.lane.b32.xlu0 %v3647_v55, %s3259_s16 }
 0xbd0   :  { %2962 = vmatpush3.bf16.xpose.msra.mxu0 %v1462_v59 }
 0xbd1   :  { %2973 = vmatprep.subr.bf16.mxu0 %v3255_v0 }
 0xbd3   :  { %1750 = vrot.lane.b32.xlu1 %v3659_v61, %s3259_s16  ;;  %1799 = vrot.lane.b32.xlu0 %v3657_v60, %s3259_s16 }
 0xbd4   :  { %2970 = vmatmul.mubr.msk.bf16.vlgmr.msra.gmra.mrb[44].mxu1 %vm150_vm2, %v1448_v40 }
 0xbd5   :  { %2981 = vmatprep.mubr.msk.bf16.mxu1 %vm3256_vm0, %v3255_v0 }
 0xbd7   :  { %2964 = vmatmul.mubr.msk.bf16.vlgmr.msra.gmra.mrb[40].mxu0 %vm150_vm2, %v1447_v41  ;;  %1991 = vrot.lane.b32.xlu1 %v1448_v40, %s3261_s18 }
 0xbd8   :  { %1943 = vrot.lane.b32.xlu0 %v1447_v41, %s3261_s18  ;;  %2975 = vmatprep.mubr.msk.bf16.mxu0 %vm3256_vm0, %v3255_v0 }
 0xc3d   :  { %v1555_v62 = vpop.permute.xlu1 %1554  ;;  %v1604_v63 = vpop.permute.xlu0 %1603 }
 0xc3e   :  { %v1560_v1 = vsel %vm150_vm2, %v1555_v62, 0  ;;  %v1609_v2 = vsel %vm150_vm2, %v1604_v63, 0 }
 0xc3f   :  { %2974 = vmatpush3.bf16.xpose.msra.mxu0 %v1560_v1  ;;  %2980 = vmatpush3.bf16.xpose.msra.mxu1 %v1609_v2 }
 0xc40   :  { %2985 = vmatprep.subr.bf16.mxu0 %v3255_v0  ;;  %2991 = vmatprep.subr.bf16.mxu1 %v3255_v0 }
 0xc41   :  { %v1653_v5 = vpop.permute.xlu1 %1652  ;;  %v1702_v6 = vpop.permute.xlu0 %1701 }
 0xc42   :  { %v1658_v7 = vsel %vm150_vm2, %v1653_v5, 0  ;;  %v1707_v8 = vsel %vm150_vm2, %v1702_v6, 0 }
 0xc45   :  { %v1751_v9 = vpop.permute.xlu1 %1750  ;;  %v1800_v11 = vpop.permute.xlu0 %1799 }
 0xc46   :  { %2976 = vmatmul.mubr.msk.bf16.vlgmr.msra.gmra.mrb[44].mxu0 %vm150_vm2, %v3640_v48  ;;  %2982 = vmatmul.mubr.msk.bf16.vlgmr.msra.gmra.mrb[48].mxu1 %vm150_vm2, %v3638_v47  ;;  %v1756_v3 = vsel %vm150_vm2, %v1751_v9, 0  ;;  %v1805_v4 = vsel %vm150_vm2, %v1800_v11, 0 }
 0xc47   :  { %2986 = vmatpush3.bf16.xpose.msra.mxu0 %v1658_v7  ;;  %2992 = vmatpush3.bf16.xpose.msra.mxu1 %v1707_v8 }
 0xc48   :  { %2987 = vmatprep.mubr.msk.bf16.mxu0 %vm3256_vm0, %v3255_v0  ;;  %2993 = vmatprep.mubr.msk.bf16.mxu1 %vm3256_vm0, %v3255_v0 }
 0xc49   :  { %2997 = vmatprep.subr.bf16.mxu0 %v3255_v0  ;;  %3003 = vmatprep.subr.bf16.mxu1 %v3255_v0  ;;  %v1992_v12 = vpop.permute.xlu1 %1991 }
 0xc4a   :  { %v1944_v13 = vpop.permute.xlu0 %1943  ;;  %v1997_v28 = vsel %vm641_vm3, %v1992_v12, 0 }
 0xc4b   :  { %v1949_v10 = vsel %vm641_vm3, %v1944_v13, 0 }
 0xc4e   :  { %2988 = vmatmul.mubr.msk.bf16.vlgmr.msra.gmra.mrb[48].mxu0 %vm150_vm2, %v3649_v29  ;;  %2994 = vmatmul.mubr.msk.bf16.vlgmr.msra.gmra.mrb[52].mxu1 %vm150_vm2, %v3647_v55 }
 0xc4f   :  { %2998 = vmatpush3.bf16.xpose.msra.mxu0 %v1756_v3  ;;  %3004 = vmatpush3.bf16.xpose.msra.mxu1 %v1805_v4 }
 0xc50   :  { %2999 = vmatprep.mubr.msk.bf16.mxu0 %vm3256_vm0, %v3255_v0  ;;  %3005 = vmatprep.mubr.msk.bf16.mxu1 %vm3256_vm0, %v3255_v0 }
 0xc51   :  { %3009 = vmatprep.subr.bf16.mxu0 %v3255_v0  ;;  %3015 = vmatprep.subr.bf16.mxu1 %v3255_v0 }
 0xc56   :  { %3000 = vmatmul.mubr.msk.bf16.vlgmr.msra.gmra.mrb[52].mxu0 %vm150_vm2, %v3659_v61  ;;  %3006 = vmatmul.mubr.msk.bf16.vlgmr.msra.gmra.mrb[56].mxu1 %vm150_vm2, %v3657_v60 }
 0xc57   :  { %3010 = vmatpush3.bf16.msra.mxu0 %v1949_v10  ;;  %3016 = vmatpush3.bf16.msra.mxu1 %v1997_v28 }
 0xc58   :  { %3011 = vmatprep.mubr.msk.bf16.mxu0 %vm3256_vm0, %v3255_v0  ;;  %3017 = vmatprep.mubr.msk.bf16.mxu1 %vm3256_vm0, %v3255_v0 }
 0xc59   :  { %3021 = vmatprep.subr.bf16.mxu0 %v3255_v0  ;;  %3027 = vmatprep.subr.bf16.mxu1 %v3255_v0 }
 0xca7   :  { %v1547_v14 = vpop.f32.mrb[44].mxu1 }
 0xca8   :  { %v2971_v16 = vpop.f32.mrb[45].mxu1  ;;  %v1850_v17 = vsel %vm150_vm2, %v1547_v14, -inf }
 0xca9   :  { %1851 = vmax.xlane.f32.xlu0 %v1850_v17  ;;  %v1550_v19 = vpop.f32.mrb[46].mxu1 }
 0xcaa   :  { %v2972_v22 = vpop.f32.mrb[47].mxu1  ;;  %v1498_v23 = vpop.f32.mrb[40].mxu0 }
 0xcab   :  { %v2965_v25 = vpop.f32.mrb[41].mxu0  ;;  %v1847_v26 = vsel %vm150_vm2, %v1498_v23, -inf }
 0xcac   :  { %1848 = vmax.xlane.f32.xlu1 %v1847_v26  ;;  %v1501_v31 = vpop.f32.mrb[42].mxu0 }
 0xcad   :  { %v2966_v32 = vpop.f32.mrb[43].mxu0 }
 0xd19   :  { %v1596_v35 = vpop.f32.mrb[44].mxu0  ;;  %v1645_v36 = vpop.f32.mrb[48].mxu1 }
 0xd1a   :  { %v2977_v52 = vpop.f32.mrb[45].mxu0  ;;  %v2983_v37 = vpop.f32.mrb[49].mxu1  ;;  %v1853_v38 = vsel %vm150_vm2, %v1596_v35, -inf  ;;  %v1856_v39 = vsel %vm150_vm2, %v1645_v36, -inf }
 0xd1b   :  { %v1599_v34 = vpop.f32.mrb[46].mxu0  ;;  %1854 = vmax.xlane.f32.xlu0 %v1853_v38  ;;  %1857 = vmax.xlane.f32.xlu1 %v1856_v39  ;;  %v1648_v40 = vpop.f32.mrb[50].mxu1 }
 0xd1c   :  { %v2978_v41 = vpop.f32.mrb[47].mxu0  ;;  %v2984_v42 = vpop.f32.mrb[51].mxu1 }
 0xd21   :  { %v3718_v43 = vpop.f32.mrb[48].mxu0  ;;  %v1743_v44 = vpop.f32.mrb[52].mxu1 }
 0xd22   :  { %v2989_v45 = vpop.f32.mrb[49].mxu0  ;;  %v2995_v20 = vpop.f32.mrb[53].mxu1  ;;  %v1859_v21 = vsel %vm150_vm2, %v3718_v43, -inf  ;;  %v1862_v49 = vsel %vm150_vm2, %v1743_v44, -inf }
 0xd23   :  { %v1697_v53 = vpop.f32.mrb[50].mxu0  ;;  %1860 = vmax.xlane.f32.xlu0 %v1859_v21  ;;  %1863 = vmax.xlane.f32.xlu1 %v1862_v49  ;;  %v1746_v54 = vpop.f32.mrb[54].mxu1 }
 0xd24   :  { %v2990_v56 = vpop.f32.mrb[51].mxu0  ;;  %v2996_v57 = vpop.f32.mrb[55].mxu1 }
 0xd29   :  { %v3723_v58 = vpop.f32.mrb[52].mxu0  ;;  %v1841_v59 = vpop.f32.mrb[56].mxu1 }
 0xd2a   :  { %v3001_v62 = vpop.f32.mrb[53].mxu0  ;;  %v3007_v63 = vpop.f32.mrb[57].mxu1  ;;  %v1865_v1 = vsel %vm150_vm2, %v3723_v58, -inf  ;;  %v1868_v2 = vsel %vm150_vm2, %v1841_v59, -inf }
 0xd2b   :  { %v1795_v5 = vpop.f32.mrb[54].mxu0  ;;  %1866 = vmax.xlane.f32.xlu0 %v1865_v1  ;;  %1869 = vmax.xlane.f32.xlu1 %v1868_v2  ;;  %v1844_v6 = vpop.f32.mrb[58].mxu1 }
 0xd2c   :  { %v3002_v7 = vpop.f32.mrb[55].mxu0  ;;  %v3008_v8 = vpop.f32.mrb[59].mxu1 }
 0xd36   :  { %v1852_v9 = vpop.xlane.xlu0 %1851 }
 0xd37   :  { %v1872_v3 = vsub.f32 %v1547_v14, %v1852_v9 }
 0xd39   :  { %v1849_v11 = vpop.xlane.xlu1 %1848  ;;  %v1881_v12 = vmul.f32 1.442695, %v1872_v3 }
 0xd3a   :  { %v1871_v4 = vsub.f32 %v1498_v23, %v1849_v11 }
 0xd3b   :  { %3215 = vpow2.f32 %v1881_v12 }
 0xd3c   :  { %2039 = vrot.lane.b32.xlu1 %v3640_v48, %s3261_s18  ;;  %v1879_v13 = vmul.f32 1.442695, %v1871_v4 }
 0xd3e   :  { %3217 = vpow2.f32 %v1879_v13 }
 0xd41   :  { %2087 = vrot.lane.b32.xlu0 %v3638_v47, %s3261_s18 }
 0xd45   :  { %v3216_v28 = vpop.eup %3215 }
 0xd46   :  { %v1898_v17 = vsel %vm150_vm2, %v3216_v28, 0.0 }
 0xd48   :  { %v3218_v10 = vpop.eup %3217 }
 0xd49   :  { %v1895_v16 = vsel %vm150_vm2, %v3218_v10, 0.0 }
 0xd60   :  { %1896 = vadd.xlane.f32.xlu0 %v1895_v16  ;;  %1899 = vadd.xlane.f32.xlu1 %v1898_v17 }
 0xd71   :  { %2135 = vrot.lane.b32.xlu1 %v3649_v29, %s3261_s18 }
 0xda8   :  { %v1855_v47 = vpop.xlane.xlu0 %1854  ;;  %v1858_v48 = vpop.xlane.xlu1 %1857 }
 0xda9   :  { %v1873_v19 = vsub.f32 %v1596_v35, %v1855_v47  ;;  %v1874_v14 = vsub.f32 %v1645_v36, %v1858_v48 }
 0xdab   :  { %v1883_v22 = vmul.f32 1.442695, %v1873_v19  ;;  %v1885_v23 = vmul.f32 1.442695, %v1874_v14 }
 0xdad   :  { %3219 = vpow2.f32 %v1883_v22 }
 0xdae   :  { %3221 = vpow2.f32 %v1885_v23 }
 0xdb0   :  { %v1864_v25 = vpop.xlane.xlu1 %1863  ;;  %v1861_v42 = vpop.xlane.xlu0 %1860 }
 0xdb1   :  { %v1876_v26 = vsub.f32 %v1743_v44, %v1864_v25  ;;  %v1875_v44 = vsub.f32 %v3718_v43, %v1861_v42 }
 0xdb3   :  { %v1889_v31 = vmul.f32 1.442695, %v1876_v26  ;;  %v1887_v20 = vmul.f32 1.442695, %v1875_v44 }
 0xdb5   :  { %3223 = vpow2.f32 %v1889_v31 }
 0xdb7   :  { %v3736_v32 = vpop.eup %3219 }
 0xdb8   :  { %v3738_v52 = vpop.eup %3221  ;;  %v1870_v37 = vpop.xlane.xlu1 %1869  ;;  %v1901_v29 = vsel %vm150_vm2, %v3736_v32, 0.0 }
 0xdb9   :  { %v1878_v38 = vsub.f32 %v1841_v59, %v1870_v37  ;;  %1902 = vadd.xlane.f32.xlu0 %v1901_v29  ;;  %v1904_v35 = vsel %vm150_vm2, %v3738_v52, 0.0  ;;  %v1867_v45 = vpop.xlane.xlu0 %1866 }
 0xdba   :  { %1905 = vadd.xlane.f32.xlu1 %v1904_v35  ;;  %v1877_v21 = vsub.f32 %v3723_v58, %v1867_v45 }
 0xdbb   :  { %v1893_v36 = vmul.f32 1.442695, %v1878_v38 }
 0xdbc   :  { %v1891_v49 = vmul.f32 1.442695, %v1877_v21  ;;  %v2040_v54 = vpop.permute.xlu1 %2039 }
 0xdbd   :  { %3225 = vpow2.f32 %v1893_v36  ;;  %v2088_v53 = vpop.permute.xlu0 %2087  ;;  %v2045_v6 = vsel %vm641_vm3, %v2040_v54, 0 }
 0xdbe   :  { %3227 = vpow2.f32 %v1887_v20  ;;  %v2093_v7 = vsel %vm641_vm3, %v2088_v53, 0 }
 0xdbf   :  { %v3744_v39 = vpop.eup %3223  ;;  %3229 = vpow2.f32 %v1891_v49 }
 0xdc0   :  { %v1910_v34 = vsel %vm150_vm2, %v3744_v39, 0.0 }
 0xdc1   :  { %1911 = vadd.xlane.f32.xlu1 %v1910_v34 }
 0xdc7   :  { %v3748_v40 = vpop.eup %3225 }
 0xdc8   :  { %v1916_v41 = vsel %vm150_vm2, %v3748_v40, 0.0  ;;  %v3758_v56 = vpop.eup %3227 }
 0xdc9   :  { %1917 = vadd.xlane.f32.xlu1 %v1916_v41  ;;  %v3762_v43 = vpop.eup %3229 }
 0xdcf   :  { %2183 = vrot.lane.b32.xlu0 %v3647_v55, %s3261_s18  ;;  %v1907_v55 = vsel %vm150_vm2, %v3758_v56, 0.0 }
 0xdda   :  { %2231 = vrot.lane.b32.xlu1 %v3659_v61, %s3261_s18  ;;  %v1913_v61 = vsel %vm150_vm2, %v3762_v43, 0.0 }
 0xded   :  { %v1897_v57 = vpop.xlane.xlu0 %1896  ;;  %v1900_v59 = vpop.xlane.xlu1 %1899 }
 0xdee   :  { %3231 = vrcp.f32 %v1897_v57  ;;  %1908 = vadd.xlane.f32.xlu0 %v1907_v55 }
 0xdef   :  { %3233 = vrcp.f32 %v1900_v59 }
 0xdf1   :  { %v2136_v8 = vpop.permute.xlu1 %2135 }
 0xdf2   :  { %1914 = vadd.xlane.f32.xlu0 %v1913_v61  ;;  %v2141_v47 = vsel %vm641_vm3, %v2136_v8, 0 }
 0xdf8   :  { %v3232_v58 = vpop.eup %3231 }
 0xdf9   :  { %v3234_v62 = vpop.eup %3233  ;;  %v1920_v63 = vmul.f32 %v3232_v58, %v3218_v10 }
 0xdfa   :  { %v1922_v1 = vmul.f32 %v3234_v62, %v3216_v28 }
 0xdfb   :  { %v1935_v2 = vpack.c.bf16 %v1920_v63, %v1920_v63 }
 0xdfc   :  { %v1936_v5 = vpack.c.bf16 %v1922_v1, %v1922_v1 }
 0xdfd   :  { %3012 = vmatmul.mubr.msk.bf16.vlgmr.msra.gmra.mrb[56].mxu0 %vm150_vm2, %v1935_v2 }
 0xdfe   :  { %3018 = vmatmul.mubr.msk.bf16.vlgmr.msra.gmra.mrb[60].mxu1 %vm150_vm2, %v1936_v5  ;;  %3022 = vmatpush3.bf16.msra.mxu0 %v2045_v6 }
 0xdff   :  { %3028 = vmatpush3.bf16.msra.mxu1 %v2093_v7  ;;  %3023 = vmatprep.mubr.msk.bf16.mxu0 %vm3256_vm0, %v3255_v0  ;;  %v3167_v7 = vld [vmem:[%s3901_s3 + $0x10] sm:$0xff]  }
 0xe00   :  { %3029 = vmatprep.mubr.msk.bf16.mxu1 %vm3256_vm0, %v3255_v0  ;;  %3033 = vmatprep.subr.bf16.mxu0 %v3255_v0 }
 0xe01   :  { %3039 = vmatprep.subr.bf16.mxu1 %v3255_v0 }
 0xe08   :  { %2279 = vrot.lane.b32.xlu0 %v3657_v60, %s3261_s18 }
 0xe46   :  { %v1903_v9 = vpop.xlane.xlu0 %1902 }
 0xe47   :  { %3235 = vrcp.f32 %v1903_v9  ;;  %v1906_v11 = vpop.xlane.xlu1 %1905 }
 0xe48   :  { %3237 = vrcp.f32 %v1906_v11 }
 0xe4a   :  { %v2184_v10 = vpop.permute.xlu0 %2183 }
 0xe4b   :  { %v2189_v60 = vsel %vm641_vm3, %v2184_v10, 0 }
 0xe4e   :  { %v1912_v3 = vpop.xlane.xlu1 %1911 }
 0xe4f   :  { %3239 = vrcp.f32 %v1912_v3 }
 0xe51   :  { %v3236_v4 = vpop.eup %3235 }
 0xe52   :  { %v3238_v12 = vpop.eup %3237  ;;  %v1924_v13 = vmul.f32 %v3236_v4, %v3736_v32 }
 0xe53   :  { %v1926_v28 = vmul.f32 %v3238_v12, %v3738_v52  ;;  %v3168_v12 = vld [vmem:[%s3901_s3 + $0x18] sm:$0xff]  }
 0xe54   :  { %v1937_v16 = vpack.c.bf16 %v1924_v13, %v1924_v13 }
 0xe55   :  { %v1938_v17 = vpack.c.bf16 %v1926_v28, %v1926_v28 }
 0xe56   :  { %3024 = vmatmul.mubr.msk.bf16.vlgmr.msra.gmra.mrb[60].mxu0 %vm150_vm2, %v1937_v16  ;;  %v1918_v22 = vpop.xlane.xlu1 %1917 }
 0xe57   :  { %3030 = vmatmul.mubr.msk.bf16.vlgmr.msra.gmra.mrb[64].mxu1 %vm150_vm2, %v1938_v17  ;;  %3034 = vmatpush3.bf16.msra.mxu0 %v2141_v47  ;;  %3241 = vrcp.f32 %v1918_v22 }
 0xe58   :  { %3040 = vmatpush3.bf16.msra.mxu1 %v2189_v60  ;;  %3041 = vmatprep.mubr.msk.bf16.mxu1 %vm3256_vm0, %v3255_v0 }
 0xe59   :  { %3051 = vmatprep.subr.bf16.mxu1 %v3255_v0  ;;  %3035 = vmatprep.mubr.msk.bf16.mxu0 %vm3256_vm0, %v3255_v0  ;;  %v3240_v48 = vpop.eup %3239 }
 0xe5a   :  { %3045 = vmatprep.subr.bf16.mxu0 %v3255_v0  ;;  %v1930_v19 = vmul.f32 %v3240_v48, %v3744_v39  ;;  %v2232_v35 = vpop.permute.xlu1 %2231 }
 0xe5b   :  { %v2237_v34 = vsel %vm641_vm3, %v2232_v35, 0 }
 0xe5c   :  { %v1940_v14 = vpack.c.bf16 %v1930_v19, %v1930_v19 }
 0xe5f   :  { %3042 = vmatmul.mubr.msk.bf16.vlgmr.msra.gmra.mrb[68].mxu1 %vm150_vm2, %v1940_v14 }
 0xe60   :  { %3053 = vmatprep.mubr.msk.bf16.mxu1 %vm3256_vm0, %v3255_v0 }
 0xe61   :  { %v3242_v25 = vpop.eup %3241 }
 0xe62   :  { %v1934_v31 = vmul.f32 %v3242_v25, %v3748_v40 }
 0xe64   :  { %v1942_v29 = vpack.c.bf16 %v1934_v31, %v1934_v31 }
 0xe7b   :  { %v1909_v23 = vpop.xlane.xlu0 %1908 }
 0xe7c   :  { %3243 = vrcp.f32 %v1909_v23 }
 0xe7f   :  { %v1915_v26 = vpop.xlane.xlu0 %1914 }
 0xe80   :  { %3245 = vrcp.f32 %v1915_v26 }
 0xe83   :  { %v2280_v32 = vpop.permute.xlu0 %2279 }
 0xe84   :  { %v2285_v52 = vsel %vm641_vm3, %v2280_v32, 0 }
 0xe85   :  { %3052 = vmatpush3.bf16.msra.mxu1 %v2285_v52 }
 0xe86   :  { %v3244_v37 = vpop.eup %3243  ;;  %3065 = vmatprep.subr.bf16.mxu1 %v3255_v0 }
 0xe87   :  { %v1928_v38 = vmul.f32 %v3244_v37, %v3758_v56 }
 0xe88   :  { %3054 = vmatmul.mubr.msk.bf16.vlgmr.msra.gmra.mrb[72].mxu1 %vm150_vm2, %v1942_v29 }
 0xe89   :  { %v1939_v36 = vpack.c.bf16 %v1928_v38, %v1928_v38  ;;  %3069 = vmatprep.mubr.msk.bf16.mxu1 %vm3256_vm0, %v3255_v0 }
 0xe8a   :  { %v3246_v39 = vpop.eup %3245 }
 0xe8b   :  { %3036 = vmatmul.mubr.msk.bf16.vlgmr.msra.gmra.mrb[64].mxu0 %vm150_vm2, %v1939_v36  ;;  %v1932_v40 = vmul.f32 %v3246_v39, %v3762_v43 }
 0xe8c   :  { %3046 = vmatpush3.bf16.msra.mxu0 %v2237_v34  ;;  %3047 = vmatprep.mubr.msk.bf16.mxu0 %vm3256_vm0, %v3255_v0 }
 0xe8d   :  { %3057 = vmatprep.subr.bf16.mxu0 %v3255_v0  ;;  %v1941_v41 = vpack.c.bf16 %v1932_v40, %v1932_v40 }
 0xe93   :  { %3048 = vmatmul.mubr.msk.bf16.vlgmr.msra.gmra.mrb[68].mxu0 %vm150_vm2, %v1941_v41  ;;  %v3833_v41 = vld [vmem:[%s3902_s4 + $0x8] sm:$0x3f] }
 0xe94   :  { %3061 = vmatprep.mubr.msk.bf16.mxu0 %vm3256_vm0, %v3255_v0  ;;  %3058 = vmatpush3.bf16.msra.mxu0 %v3167_v7  ;;  %v3172_v7 = vld [vmem:[%s3904_s7 + $0x28] sm:$0xff]  }
 0xe95   :  { %3059 = vmatprep.subr.bf16.mxu0 %v3255_v0 }
 0xe98   :  { %3060 = vmatpush3.bf16.msra.mxu0 %v3168_v12 }
 0xe99   :  { %3073 = vmatprep.subr.bf16.mxu0 %v3255_v0 }
 0xed0   :  { %v1985_v42 = vpop.f32.mrb[56].mxu0 }
 0xed1   :  { %v2033_v44 = vpop.f32.mrb[60].mxu1  ;;  %v3013_v45 = vpop.f32.mrb[57].mxu0 }
 0xed2   :  { %v3019_v20 = vpop.f32.mrb[61].mxu1  ;;  %v1988_v21 = vpop.f32.mrb[58].mxu0 }
 0xed3   :  { %v2036_v49 = vpop.f32.mrb[62].mxu1  ;;  %v3014_v53 = vpop.f32.mrb[59].mxu0 }
 0xed4   :  { %v3020_v54 = vpop.f32.mrb[63].mxu1 }
 0xf29   :  { %v2081_v56 = vpop.f32.mrb[60].mxu0 }
 0xf2a   :  { %v2129_v57 = vpop.f32.mrb[64].mxu1  ;;  %v3025_v59 = vpop.f32.mrb[61].mxu0 }
 0xf2b   :  { %v3140_v55 = vpack.i.bf16 %v2129_v57, %v2081_v56  ;;  %v3031_v43 = vpop.f32.mrb[65].mxu1  ;;  %v2084_v61 = vpop.f32.mrb[62].mxu0 }
 0xf2c   :  { %v2132_v58 = vpop.f32.mrb[66].mxu1  ;;  %v3026_v62 = vpop.f32.mrb[63].mxu0 }
 0xf2d   :  { %3141 = vrot.lane.b32.xlu1 %v3140_v55, %s3262_s19  ;;  %v3032_v63 = vpop.f32.mrb[67].mxu1 }
 0xf32   :  { %v2225_v1 = vpop.f32.mrb[68].mxu1 }
 0xf33   :  { %v3043_v2 = vpop.f32.mrb[69].mxu1 }
 0xf34   :  { %v2228_v5 = vpop.f32.mrb[70].mxu1 }
 0xf35   :  { %v3044_v6 = vpop.f32.mrb[71].mxu1  ;;  %v3170_v5 = vld [vmem:[%s3903_s5 + $0x18] sm:$0xff]  }
 0xf36   :  { %v3171_v6 = vld [vmem:[%s3904_s7 + $0x20] sm:$0xff]  }
 0xf5b   :  { %v2321_v8 = vpop.f32.mrb[72].mxu1 }
 0xf5c   :  { %v3055_v9 = vpop.f32.mrb[73].mxu1 }
 0xf5d   :  { %v2324_v11 = vpop.f32.mrb[74].mxu1 }
 0xf5e   :  { %v2177_v3 = vpop.f32.mrb[64].mxu0  ;;  %v3056_v4 = vpop.f32.mrb[75].mxu1 }
 0xf5f   :  { %v3145_v13 = vpack.i.bf16 %v2225_v1, %v2177_v3  ;;  %v3037_v28 = vpop.f32.mrb[65].mxu0 }
 0xf60   :  { %v2180_v10 = vpop.f32.mrb[66].mxu0  ;;  %v2449_v28 = vrot.slane %v3833_v41, %v1145_v18  ;;  %v3174_v18 = vld [vmem:[%s3904_s7 + $0x38] sm:$0xff]  }
 0xf61   :  { %v3038_v16 = vpop.f32.mrb[67].mxu0  ;;  %3146 = vrot.lane.b32.xlu0 %v3145_v13, %s3263_s24 }
 0xf66   :  { %v2273_v17 = vpop.f32.mrb[68].mxu0 }
 0xf67   :  { %v3150_v47 = vpack.i.bf16 %v2321_v8, %v2273_v17  ;;  %v3049_v60 = vpop.f32.mrb[69].mxu0 }
 0xf68   :  { %v2276_v48 = vpop.f32.mrb[70].mxu0  ;;  %v2455_v60 = vrot.slane %v3833_v41, %v1151_v24  ;;  %v2720_v24 = vld [vmem:[%s3905_s6 + $0x1] ss:$0 sm:$0xff] }
 0xf69   :  { %v3050_v19 = vpop.f32.mrb[71].mxu0  ;;  %3151 = vrot.lane.b32.xlu1 %v3150_v47, %s3264_s25 }
 0xf9f   :  { %v3142_v14 = vpop.permute.xlu1 %3141 }
 0xfa0   :  { %v3144_v23 = vunpack.i.h.bf16 %v3142_v14  ;;  %v3143_v25 = vunpack.i.l.bf16 %v3142_v14 }
 0xfa2   :  { %v2352_v52 = vsel %vm150_vm2, %v2033_v44, %v3144_v23  ;;  %v2351_v37 = vsel %vm150_vm2, %v1985_v42, %v3143_v25  ;;  %v2361_v42 = vrot.slane %v3833_v41, %v1056_v51  ;;  %v3173_v23 = vld [vmem:[%s3904_s7 + $0x30] sm:$0xff]  }
 0xfd3   :  { %v3147_v22 = vpop.permute.xlu0 %3146 }
 0xfd4   :  { %v3149_v26 = vunpack.i.h.bf16 %v3147_v22  ;;  %v3148_v31 = vunpack.i.l.bf16 %v3147_v22 }
 0xfd6   :  { %v2354_v35 = vsel %vm1047_vm4, %v2352_v52, %v3149_v26  ;;  %v2353_v36 = vsel %vm1047_vm4, %v2351_v37, %v3148_v31 }
 0xfdb   :  { %v3152_v32 = vpop.permute.xlu1 %3151 }
 0xfdc   :  { %v3154_v29 = vunpack.i.h.bf16 %v3152_v32  ;;  %v3153_v38 = vunpack.i.l.bf16 %v3152_v32 }
 0xfde   :  { %v2356_v39 = vsel %vm1050_vm5, %v2354_v35, %v3154_v29  ;;  %v2355_v34 = vsel %vm1050_vm5, %v2353_v36, %v3153_v38 }
 0xfdf   :  { %v2357_v40 = vpack.c.bf16 %v2356_v39, %v2355_v34 }
 0xfe1   :  { %3062 = vmatmul.mubr.msk.bf16.vlgmr.msra.gmra.mrb[72].mxu0 %vm74_vm1, %v2357_v40 }
 0xfe2   :  { %3081 = vmatprep.mubr.msk.bf16.mxu0 %vm3256_vm0, %v3255_v0  ;;  %3074 = vmatpush3.bf16.msra.mxu0 %v3171_v6  ;;  %v2633_v6 = vrot.slane %v3833_v41, %v1330_v15 }
 0xfe3   :  { %3075 = vmatprep.subr.bf16.mxu0 %v3255_v0 }
 0xfe6   :  { %3076 = vmatpush3.bf16.msra.mxu0 %v3172_v7 }
 0xfe7   :  { %3077 = vmatprep.subr.bf16.mxu0 %v3255_v0 }
 0xfea   :  { %3078 = vmatpush3.bf16.msra.mxu0 %v3173_v23 }
 0xfeb   :  { %3079 = vmatprep.subr.bf16.mxu0 %v3255_v0 }
 0xfee   :  { %3080 = vmatpush3.bf16.msra.mxu0 %v3174_v18 }
0x10b4   :  { %v2411_v44 = vpop.f32.mrb[72].mxu0 }
0x10b5   :  { %v2412_v45 = vadd.f32 %v2411_v44, %v2361_v42  ;;  %v3063_v20 = vpop.f32.mrb[73].mxu0 }
0x10b6   :  { %v2414_v21 = vpop.f32.mrb[74].mxu0 }
0x10b7   :  { %v2415_v49 = vadd.f32 %v2414_v21, %v2361_v42  ;;  %v3064_v53 = vpop.f32.mrb[75].mxu0  ;;  %v2418_v54 = vadd.f32 %v2412_v45, %v3621_v27 }
0x10b9   :  { %v2420_v56 = vsel %vm74_vm1, %v2418_v54, 0.0  ;;  %v2419_v57 = vadd.f32 %v2415_v49, %v3623_v30  ;;  %v3169_v30 = vld [vmem:[%s3903_s5 + $0x10] sm:$0xff]  }
0x10ba   :  { %2421 = vadd.xlane.f32.xlu0 %v2420_v56  ;;  %3066 = vmatpush3.bf16.msra.mxu1 %v3169_v30  ;;  %v2627_v30 = vrot.slane %v3833_v41, %v1324_v33 }
0x10bb   :  { %v2423_v59 = vsel %vm74_vm1, %v2419_v57, 0.0  ;;  %3067 = vmatprep.subr.bf16.mxu1 %v3255_v0  ;;  %v2527_v0 = vrot.slane %v3833_v41, %v1223_v46 }
0x10bc   :  { %2424 = vadd.xlane.f32.xlu1 %v2423_v59 }
0x10be   :  { %3068 = vmatpush3.bf16.msra.mxu1 %v3170_v5 }
0x1147   :  { %v2422_v55 = vpop.xlane.xlu0 %2421 }
0x1148   :  { %v2426_v43 = vmul.f32 0.03125, %v2422_v55 }
0x1149   :  { %v2425_v61 = vpop.xlane.xlu1 %2424 }
0x114a   :  { %v2428_v51 = vsub.f32 %v2418_v54, %v2426_v43  ;;  %v2427_v58 = vmul.f32 0.03125, %v2425_v61 }
0x114c   :  { %v2429_v62 = vsub.f32 %v2419_v57, %v2427_v58  ;;  %v2430_v63 = vmul.f32 %v2428_v51, %v2428_v51 }
0x114e   :  { %v2432_v1 = vsel %vm74_vm1, %v2430_v63, 0.0  ;;  %v2431_v2 = vmul.f32 %v2429_v62, %v2429_v62 }
0x114f   :  { %2433 = vadd.xlane.f32.xlu0 %v2432_v1 }
0x1150   :  { %v2435_v27 = vsel %vm74_vm1, %v2431_v2, 0.0 }
0x1153   :  { %2436 = vadd.xlane.f32.xlu0 %v2435_v27 }
0x11dc   :  { %v2434_v8 = vpop.xlane.xlu0 %2433 }
0x11dd   :  { %v2438_v9 = vmul.f32 0.03125, %v2434_v8 }
0x11df   :  { %v2440_v11 = vadd.f32 1e-05, %v2438_v9 }
0x11e0   :  { %v2437_v3 = vpop.xlane.xlu0 %2436 }
0x11e1   :  { %3247 = vrsqrt.f32 %v2440_v11  ;;  %v2439_v4 = vmul.f32 0.03125, %v2437_v3 }
0x11e3   :  { %v2441_v12 = vadd.f32 1e-05, %v2439_v4 }
0x11e5   :  { %3249 = vrsqrt.f32 %v2441_v12 }
0x11eb   :  { %v3248_v13 = vpop.eup %3247 }
0x11ec   :  { %v2444_v10 = vmul.f32 %v3248_v13, %v2428_v51 }
0x11ee   :  { %v2450_v17 = vmul.f32 %v2449_v28, %v2444_v10 }
0x11ef   :  { %v3250_v16 = vpop.eup %3249 }
0x11f0   :  { %v2445_v47 = vmul.f32 %v3250_v16, %v2429_v62  ;;  %v2456_v19 = vadd.f32 %v2455_v60, %v2450_v17 }
0x11f2   :  { %v2451_v48 = vmul.f32 %v2449_v28, %v2445_v47 }
0x11f4   :  { %v2457_v14 = vadd.f32 %v2455_v60, %v2451_v48 }
0x11f6   :  { %v2458_v22 = vpack.c.bf16 %v2457_v14, %v2456_v19 }
0x11f8   :  { %3070 = vmatmul.mubr.msk.bf16.vlgmr.msra.gmra.mrb[76].mxu1 %vm74_vm1, %v2458_v22 }
0x12cb   :  { %v2514_v25 = vpop.f32.mrb[76].mxu1 }
0x12cc   :  { %v2515_v26 = vadd.f32 %v2720_v24, %v2514_v25  ;;  %v3071_v31 = vpop.f32.mrb[77].mxu1 }
0x12cd   :  { %v2517_v32 = vpop.f32.mrb[78].mxu1 }
0x12ce   :  { %v2518_v52 = vadd.f32 %v2720_v24, %v2517_v32  ;;  %v3072_v37 = vpop.f32.mrb[79].mxu1  ;;  %v2521_v29 = vmax.f32 %v2515_v26, 0.0 }
0x12d0   :  { %v2522_v38 = vmax.f32 %v2518_v52, 0.0 }
0x12d2   :  { %v2523_v35 = vpack.c.bf16 %v2522_v38, %v2521_v29 }
0x12d4   :  { %3082 = vmatmul.mubr.msk.bf16.vlgmr.msra.gmra.mrb[76].mxu0 %vm1249_vm6, %v2523_v35 }
0x13a7   :  { %v2589_v36 = vpop.f32.mrb[76].mxu0 }
0x13a8   :  { %v2590_v39 = vadd.f32 %v2589_v36, %v2527_v0  ;;  %v3083_v34 = vpop.f32.mrb[77].mxu0 }
0x13a9   :  { %v2592_v40 = vpop.f32.mrb[78].mxu0 }
0x13aa   :  { %v2593_v42 = vadd.f32 %v2592_v40, %v2527_v0  ;;  %v3084_v44 = vpop.f32.mrb[79].mxu0  ;;  %v2596_v45 = vadd.f32 %v2590_v39, %v2456_v19 }
0x13ac   :  { %v2598_v20 = vsel %vm74_vm1, %v2596_v45, 0.0  ;;  %v2597_v21 = vadd.f32 %v2593_v42, %v2457_v14 }
0x13ad   :  { %2599 = vadd.xlane.f32.xlu1 %v2598_v20 }
0x13ae   :  { %v2601_v49 = vsel %vm74_vm1, %v2597_v21, 0.0 }
0x13af   :  { %2602 = vadd.xlane.f32.xlu0 %v2601_v49 }
0x143a   :  { %v2600_v53 = vpop.xlane.xlu1 %2599 }
0x143b   :  { %v2604_v54 = vmul.f32 0.03125, %v2600_v53 }
0x143c   :  { %v2603_v56 = vpop.xlane.xlu0 %2602 }
0x143d   :  { %v2606_v57 = vsub.f32 %v2596_v45, %v2604_v54  ;;  %v2605_v59 = vmul.f32 0.03125, %v2603_v56 }
0x143f   :  { %v2607_v46 = vsub.f32 %v2597_v21, %v2605_v59  ;;  %v2608_v55 = vmul.f32 %v2606_v57, %v2606_v57 }
0x1441   :  { %v2610_v43 = vsel %vm74_vm1, %v2608_v55, 0.0  ;;  %v2609_v61 = vmul.f32 %v2607_v46, %v2607_v46 }
0x1442   :  { %2611 = vadd.xlane.f32.xlu1 %v2610_v43 }
0x1443   :  { %v2613_v51 = vsel %vm74_vm1, %v2609_v61, 0.0 }
0x1444   :  { %2614 = vadd.xlane.f32.xlu0 %v2613_v51 }
0x14cf   :  { %v2612_v58 = vpop.xlane.xlu1 %2611 }
0x14d0   :  { %v2616_v62 = vmul.f32 0.03125, %v2612_v58 }
0x14d1   :  { %v2615_v63 = vpop.xlane.xlu0 %2614 }
0x14d2   :  { %v2618_v1 = vadd.f32 1e-05, %v2616_v62  ;;  %v2617_v2 = vmul.f32 0.03125, %v2615_v63 }
0x14d4   :  { %3251 = vrsqrt.f32 %v2618_v1  ;;  %v2619_v27 = vadd.f32 1e-05, %v2617_v2 }
0x14d6   :  { %3253 = vrsqrt.f32 %v2619_v27 }
0x14de   :  { %v3252_v5 = vpop.eup %3251 }
0x14df   :  { %v2622_v7 = vmul.f32 %v3252_v5, %v2606_v57 }
0x14e0   :  { %v3254_v8 = vpop.eup %3253 }
0x14e1   :  { %v2628_v9 = vmul.f32 %v2627_v30, %v2622_v7  ;;  %v2623_v11 = vmul.f32 %v3254_v8, %v2607_v46 }
0x14e3   :  { %v2634_v3 = vadd.f32 %v2633_v6, %v2628_v9  ;;  %v2629_v4 = vmul.f32 %v2627_v30, %v2623_v11 }
0x14e5   :  { %2636 = vst.msk [vmem:[%s3906_s8] sm:$0xff] %vm74_vm1, %v2634_v3  ;;  %v2635_v12 = vadd.f32 %v2633_v6, %v2629_v4 }
0x14e7   :  { %2637 = vst.msk [vmem:[%s3906_s8 + $0x8] sm:$0xff] %vm74_vm1, %v2635_v12 }

</bundles_post_ra>
